<compile_context>
chip_gen: v5e
topology: v5e:2x2
jax: 0.10.0
libtpu: 0.0.40
codegen_flags: <defaults>
</compile_context>

<pallas_src>
import numpy as np
import jax
import jax.numpy as jnp
from jax.experimental import pallas as pl
from jax.experimental.pallas import tpu as pltpu

EPS = 1e-8


# ---------------------------------------------------------------------------
# in-kernel helpers (traced inside the Pallas kernel body)
# ---------------------------------------------------------------------------
def _glob_ln(h, gamma, beta, ones_t):
    """Global LayerNorm over a [T, C] slab; gamma/beta broadcast as [1, C].

    The two full-slab reductions (sum, sum of squares) run on the MXU via a
    ones-row matmul; only a cheap [1, C] lane reduce remains on the VPU/XLU.
    Variance = E[x^2] - mean^2, clamped at 0 (guards f32 cancellation), and the
    rsqrt goes to the EUP slot.
    """
    n = float(h.shape[0] * h.shape[1])
    col_sum = jnp.dot(ones_t, h, preferred_element_type=jnp.float32)        # [1, C]
    col_sumsq = jnp.dot(ones_t, h * h, preferred_element_type=jnp.float32)  # [1, C]
    mean = jnp.sum(col_sum) * (1.0 / n)
    mean_sq = jnp.sum(col_sumsq) * (1.0 / n)
    var = jnp.maximum(mean_sq - mean * mean, 0.0)
    inv = jax.lax.rsqrt(var + EPS)
    return gamma * ((h - mean) * inv) + beta


def _prelu(h, a):
    return jnp.where(h >= 0, h, a * h)


# ---------------------------------------------------------------------------
# fused kernel: bottleneck (r==0) + n_blocks Conv1DBlocks per grid step
# (statically unrolled, static dilations 1,2,4,...) + head (last r)
# ---------------------------------------------------------------------------
def make_tcn_kernel(T, n_blocks, kernel_size, hid_chan, max_pad, pad_lo):
    K = kernel_size
    assert K % 2 == 1, "residual add requires odd kernel_size (same-length conv)"

    def kernel(x_ref,                          # [1, T, in_chan]
               bn_g_ref, bn_b_ref,             # [1, in_chan]
               bn_w_ref, bn_bias_ref,          # [in_chan, bn] bf16, [1, bn]
               in_w_ref, in_b_ref,             # [n_blocks, bn, hid] bf16, [n_blocks, 1, hid]
               a1_ref,                         # [n_blocks, 1, 1]
               ln1_g_ref, ln1_b_ref,           # [n_blocks, 1, hid]
               dw_w_ref, dw_b_ref,             # [n_blocks, K, hid], [n_blocks, 1, hid]
               a2_ref,                         # [n_blocks, 1, 1]
               ln2_g_ref, ln2_b_ref,           # [n_blocks, 1, hid]
               res_w_ref, res_b_ref,           # [n_blocks, hid, bn] bf16, [n_blocks, 1, bn]
               out_a_ref,                      # [1, 1]
               out_ref,                        # [1, 1, bn]  (PReLU + mean over T)
               out_acc,                        # VMEM [T, bn] f32 residual stream
               hp_ref):                        # VMEM [pad_lo + T + max_pad, hid] bf16
        r = pl.program_id(1)
        ones_t = jnp.ones((1, T), jnp.float32)   # MXU reduction row (constant)

        # NOTE: correctness relies on (a) the grid being iterated b-outer /
        # r-inner so out_acc/hp_ref are re-initialized at r==0 before reuse,
        # (b) hp_ref's pad regions staying zero across all repeats (only the
        # middle [pad_lo, pad_lo+T) rows are ever rewritten), and (c) scratch
        # being per-core when B is sharded across TensorCores.
        @pl.when(r == 0)
        def _():
            hp_ref[...] = jnp.zeros_like(hp_ref)
            # Bottleneck: GlobLN(in_chan) -> 1x1 conv (matmul over channels).
            x = x_ref[0]
            y = _glob_ln(x, bn_g_ref[...], bn_b_ref[...], ones_t)
            out_acc[...] = (jnp.dot(y.astype(jnp.bfloat16), bn_w_ref[...],
                                    preferred_element_type=jnp.float32)
                            + bn_bias_ref[...])

        # ---- n_blocks Conv1DBlocks of this repeat, statically unrolled ----
        for j in range(n_blocks):
            d = 2 ** j                         # static dilation
            pad = (K - 1) * d // 2             # static "same" padding

            # 1x1 in-conv -> PReLU -> GlobLN  (bf16 MXU, f32 accumulate).
            # out_acc is read exactly where it is consumed (short live range).
            h = (jnp.dot(out_acc[...].astype(jnp.bfloat16), in_w_ref[j],
                         preferred_element_type=jnp.float32) + in_b_ref[j])
            h = _prelu(h, a1_ref[j])
            h = _glob_ln(h, ln1_g_ref[j], ln1_b_ref[j], ones_t)

            # Depthwise dilated conv, "same" length, all offsets static.
            hp_ref[pad_lo:pad_lo + T, :] = h.astype(jnp.bfloat16)
            dw = dw_w_ref[j]                   # [K, hid] f32
            acc = jnp.zeros((T, hid_chan), jnp.float32)
            for k in range(K):                 # K is small & static
                start = pad_lo - pad + k * d   # static, pads around are zero
                acc = acc + dw[k:k + 1, :] * hp_ref[start:start + T, :].astype(
                    jnp.float32)
            h = acc + dw_b_ref[j]

            h = _prelu(h, a2_ref[j])
            h = _glob_ln(h, ln2_g_ref[j], ln2_b_ref[j], ones_t)

            # 1x1 res-conv + residual add (re-read out_acc here).
            res = (jnp.dot(h.astype(jnp.bfloat16), res_w_ref[j],
                           preferred_element_type=jnp.float32) + res_b_ref[j])
            out_acc[...] = out_acc[...] + res

        # ---- fused output head: PReLU -> mean over time (MXU reduction) ----
        # (the 1x1 conv to n_src is linear, so it commutes with the mean and
        #  runs as a tiny matmul in plain JAX on the pooled [B, bn] output)
        @pl.when(r == pl.num_programs(1) - 1)
        def _():
            o = _prelu(out_acc[...], out_a_ref[...])
            out_ref[0] = (jnp.dot(ones_t, o, preferred_element_type=jnp.float32)
                          * (1.0 / T))

    return kernel


# ---------------------------------------------------------------------------
# wrapper
# ---------------------------------------------------------------------------
def tcn_adv_forward(mixture_w, params, *, hid_chan, kernel_size,
                    n_blocks, n_repeats, n_src):
    B, T, in_chan = mixture_w.shape
    bn_chan = params['bn_w'].shape[1]
    K = kernel_size
    max_d = 2 ** (n_blocks - 1)
    max_pad = (K - 1) * max_d // 2
    pad_lo = ((max_pad + 15) // 16) * 16 if max_pad > 0 else 0   # bf16-tile aligned

    kernel = make_tcn_kernel(T, n_blocks, K, hid_chan, max_pad, pad_lo)

    # bf16 operands for the MXU 1x1 convs (accumulation stays f32 in-kernel).
    bn_w = params['bn_w'].astype(jnp.bfloat16)
    in_w = params['in_w'].astype(jnp.bfloat16)
    res_w = params['res_w'].astype(jnp.bfloat16)

    def inv_spec(shape):
        # grid-invariant tensors (bottleneck / head params): fetched once
        nd = len(shape)
        return pl.BlockSpec(tuple(shape), lambda b, r, _nd=nd: (0,) * _nd)

    def blk_spec(shape):
        # per-block tensors stacked on a leading NB dim: one repeat's worth of
        # blocks streamed per grid step (double buffered by BlockSpec).
        nd = len(shape)
        return pl.BlockSpec((n_blocks,) + tuple(shape[1:]),
                            lambda b, r, _nd=nd: (r,) + (0,) * (_nd - 1))

    weight_args = [
        params['bn_g'], params['bn_b'], bn_w, params['bn_bias'],       # invariant
        in_w, params['in_b'], params['a1'],                             # per-block
        params['ln1_g'], params['ln1_b'],
        params['dw_w'], params['dw_b'], params['a2'],
        params['ln2_g'], params['ln2_b'],
        res_w, params['res_b'],
        params['out_a'],                                                # invariant
    ]
    per_block = set(range(4, 16))

    in_specs = [pl.BlockSpec((1, T, in_chan), lambda b, r: (b, 0, 0))]
    for idx, w in enumerate(weight_args):
        in_specs.append(blk_spec(w.shape) if idx in per_block else inv_spec(w.shape))

    out_spec = pl.BlockSpec((1, 1, bn_chan), lambda b, r: (b, 0, 0))

    # ---- explicit VMEM budget + advisory cost estimate ----
    def nbytes(a):
        return int(a.size) * a.dtype.itemsize

    stream_bytes = 2 * sum(nbytes(weight_args[i]) // n_repeats for i in per_block)
    inv_bytes = sum(nbytes(weight_args[i]) for i in range(len(weight_args))
                    if i not in per_block)
    scratch_bytes = T * bn_chan * 4 + (pad_lo + T + max_pad) * hid_chan * 2
    io_bytes = 2 * (T * in_chan * 4) + 2 * (bn_chan * 4)
    vmem_needed = stream_bytes + inv_bytes + scratch_bytes + io_bytes
    vmem_limit = int(min(max(2 * vmem_needed, 32 * 1024 * 1024),
                         64 * 1024 * 1024))   # stay under v7x's 64 MiB ceiling

    NB = n_blocks * n_repeats
    flops = B * (2 * T * in_chan * bn_chan
                 + NB * (4 * T * bn_chan * hid_chan
                         + 2 * T * hid_chan * K
                         + 24 * T * hid_chan))
    cost = pl.CostEstimate(
        flops=int(flops),
        transcendentals=int(B * (1 + 2 * NB)),
        bytes_accessed=int(nbytes(mixture_w)
                           + sum(nbytes(w) for w in weight_args)
                           + B * bn_chan * 4))

    pooled = pl.pallas_call(
        kernel,
        out_shape=jax.ShapeDtypeStruct((B, 1, bn_chan), jnp.float32),
        grid_spec=pltpu.PrefetchScalarGridSpec(
            num_scalar_prefetch=0,
            grid=(B, n_repeats),
            in_specs=in_specs,
            out_specs=out_spec,
            scratch_shapes=[
                pltpu.VMEM((T, bn_chan), jnp.float32),                     # residual
                pltpu.VMEM((pad_lo + T + max_pad, hid_chan), jnp.bfloat16),  # dw pad buf
            ]),
        compiler_params=pltpu.CompilerParams(
            # v7x: if profiling shows B isn't split across the 2 TCs, switch
            # the batch axis to pltpu.CORE_PARALLEL (scratch is per-core, and
            # out_acc/hp_ref are re-initialized at r==0, so the split is safe).
            dimension_semantics=("parallel", "arbitrary"),
            vmem_limit_bytes=vmem_limit),
        cost_estimate=cost,
    )(mixture_w, *weight_args)

    pooled = pooled[:, 0, :]                                  # [B, bn_chan]
    strong = pooled @ params['out_w'] + params['out_b']       # tiny 1x1 conv in JAX
    if n_src == 1:                                            # matches torch .squeeze(-1)
        strong = strong[:, 0]
    return strong


# ---------------------------------------------------------------------------
# deterministic parameter init (synthetic; mirrors the module's shapes)
# ---------------------------------------------------------------------------
def init_params(key, in_chan, bn_chan, hid_chan, kernel_size,
                n_blocks, n_repeats, n_src):
    NB = n_blocks * n_repeats
    keys = jax.random.split(key, 10)

    def w(k, shape, scale=0.1):
        return (scale * jax.random.normal(k, shape)).astype(jnp.float32)

    return {
        'bn_g': jnp.ones((1, in_chan), jnp.float32),
        'bn_b': jnp.zeros((1, in_chan), jnp.float32),
        'bn_w': w(keys[0], (in_chan, bn_chan)),
        'bn_bias': w(keys[1], (1, bn_chan)),
        'in_w': w(keys[2], (NB, bn_chan, hid_chan)),
        'in_b': w(keys[3], (NB, 1, hid_chan)),
        'a1': jnp.full((NB, 1, 1), 0.25, jnp.float32),
        'ln1_g': jnp.ones((NB, 1, hid_chan), jnp.float32),
        'ln1_b': jnp.zeros((NB, 1, hid_chan), jnp.float32),
        'dw_w': w(keys[4], (NB, kernel_size, hid_chan)),
        'dw_b': w(keys[5], (NB, 1, hid_chan)),
        'a2': jnp.full((NB, 1, 1), 0.25, jnp.float32),
        'ln2_g': jnp.ones((NB, 1, hid_chan), jnp.float32),
        'ln2_b': jnp.zeros((NB, 1, hid_chan), jnp.float32),
        'res_w': w(keys[6], (NB, hid_chan, bn_chan)),
        'res_b': w(keys[7], (NB, 1, bn_chan)),
        'out_a': jnp.full((1, 1), 0.25, jnp.float32),
        'out_w': w(keys[8], (bn_chan, n_src)),
        'out_b': w(keys[9], (1, n_src)),
    }


# ---------------------------------------------------------------------------
# pure-JAX f32 reference (module semantics; used only to validate the kernel)
# ---------------------------------------------------------------------------
def ref_forward(x, p, dilations, kernel_size, n_src):
    def globln(h, g, b):
        mean = jnp.mean(h)
        var = jnp.mean((h - mean) ** 2)
        return g * ((h - mean) / jnp.sqrt(var + EPS)) + b

    def prelu(h, a):
        return jnp.where(h >= 0, h, a * h)

    B, T, _ = x.shape
    K = kernel_size
    outs = []
    for bi in range(B):
        h = x[bi]
        y = globln(h, p['bn_g'], p['bn_b'])
        out = y @ p['bn_w'] + p['bn_bias']
        for i, d in enumerate(dilations):
            t = out @ p['in_w'][i] + p['in_b'][i]
            t = prelu(t, p['a1'][i])
            t = globln(t, p['ln1_g'][i], p['ln1_b'][i])
            pad = (K - 1) * d // 2
            tp = jnp.pad(t, ((pad, pad), (0, 0)))
            acc = sum(p['dw_w'][i][k:k + 1] * tp[k * d:k * d + T]
                      for k in range(K))
            t = acc + p['dw_b'][i]
            t = prelu(t, p['a2'][i])
            t = globln(t, p['ln2_g'][i], p['ln2_b'][i])
            out = out + (t @ p['res_w'][i] + p['res_b'][i])
        h2 = prelu(out, p['out_a'])
        strong = jnp.mean(h2 @ p['out_w'] + p['out_b'], axis=0)
        outs.append(strong)
    res = jnp.stack(outs)
    if n_src == 1:
        res = res[:, 0]
    return res


if __name__ == "__main__":
    # small shapes consistent with the module (in_chan feats, T frames)
    B, T = 2, 16
    in_chan, bn_chan, hid_chan = 8, 16, 32
    kernel_size, n_blocks, n_repeats, n_src = 3, 3, 2, 1
    dilations = tuple(2 ** b for _ in range(n_repeats) for b in range(n_blocks))

    key = jax.random.PRNGKey(0)
    kx, kp = jax.random.split(key)
    mixture_w = jax.random.normal(kx, (B, T, in_chan), jnp.float32)
    params = init_params(kp, in_chan, bn_chan, hid_chan, kernel_size,
                         n_blocks, n_repeats, n_src)

    out = tcn_adv_forward(mixture_w, params, hid_chan=hid_chan,
                          kernel_size=kernel_size, n_blocks=n_blocks,
                          n_repeats=n_repeats, n_src=n_src)
    out = jax.block_until_ready(out)

    ref = ref_forward(mixture_w, params, dilations, kernel_size, n_src)
    assert out.shape == ref.shape, (out.shape, ref.shape)
    # bf16 matmul operands (f32 accumulation) + bf16 depthwise pad buffer ->
    # validate against the f32 module-semantics reference at a looser tolerance.
    np.testing.assert_allclose(np.asarray(out), np.asarray(ref),
                               rtol=2e-2, atol=2e-2)
    print("KERNEL_OK")
</pallas_src>

<mosaic_0001>
module attributes {stable_mosaic.version = 11 : i64} {
  func.func @kernel(%arg0: i32, %arg1: i32, %arg2: memref<1x16x8xf32, #tpu.memory_space<vmem>>, %arg3: memref<1x8xf32, #tpu.memory_space<vmem>>, %arg4: memref<1x8xf32, #tpu.memory_space<vmem>>, %arg5: memref<8x16xbf16, #tpu.memory_space<vmem>>, %arg6: memref<1x16xf32, #tpu.memory_space<vmem>>, %arg7: memref<3x16x32xbf16, #tpu.memory_space<vmem>>, %arg8: memref<3x1x32xf32, #tpu.memory_space<vmem>>, %arg9: memref<3x1x1xf32, #tpu.memory_space<vmem>>, %arg10: memref<3x1x32xf32, #tpu.memory_space<vmem>>, %arg11: memref<3x1x32xf32, #tpu.memory_space<vmem>>, %arg12: memref<3x3x32xf32, #tpu.memory_space<vmem>>, %arg13: memref<3x1x32xf32, #tpu.memory_space<vmem>>, %arg14: memref<3x1x1xf32, #tpu.memory_space<vmem>>, %arg15: memref<3x1x32xf32, #tpu.memory_space<vmem>>, %arg16: memref<3x1x32xf32, #tpu.memory_space<vmem>>, %arg17: memref<3x32x16xbf16, #tpu.memory_space<vmem>>, %arg18: memref<3x1x16xf32, #tpu.memory_space<vmem>>, %arg19: memref<1x1xf32, #tpu.memory_space<vmem>>, %arg20: memref<1x1x16xf32, #tpu.memory_space<vmem>>, %arg21: memref<16x16xf32, #tpu.memory_space<vmem>>, %arg22: memref<36x32xbf16, #tpu.memory_space<vmem>>) attributes {dimension_semantics = [#tpu.dimension_semantics<parallel>, #tpu.dimension_semantics<arbitrary>], iteration_bounds = array<i64: 2, 2>, scalar_prefetch = 0 : i64, scratch_operands = 2 : i64, tpu.core_type = #tpu.core_type<tc>, window_params = [{transform_indices = @transform_0, window_bounds = array<i64: 1, 16, 8>}, {pipeline_mode = #tpu.pipeline_mode<synchronous>, transform_indices = @transform_1, window_bounds = array<i64: 1, 8>}, {pipeline_mode = #tpu.pipeline_mode<synchronous>, transform_indices = @transform_2, window_bounds = array<i64: 1, 8>}, {pipeline_mode = #tpu.pipeline_mode<synchronous>, transform_indices = @transform_3, window_bounds = array<i64: 8, 16>}, {pipeline_mode = #tpu.pipeline_mode<synchronous>, transform_indices = @transform_4, window_bounds = array<i64: 1, 16>}, {transform_indices = @transform_5, window_bounds = array<i64: 3, 16, 32>}, {transform_indices = @transform_6, window_bounds = array<i64: 3, 1, 32>}, {transform_indices = @transform_7, window_bounds = array<i64: 3, 1, 1>}, {transform_indices = @transform_8, window_bounds = array<i64: 3, 1, 32>}, {transform_indices = @transform_9, window_bounds = array<i64: 3, 1, 32>}, {transform_indices = @transform_10, window_bounds = array<i64: 3, 3, 32>}, {transform_indices = @transform_11, window_bounds = array<i64: 3, 1, 32>}, {transform_indices = @transform_12, window_bounds = array<i64: 3, 1, 1>}, {transform_indices = @transform_13, window_bounds = array<i64: 3, 1, 32>}, {transform_indices = @transform_14, window_bounds = array<i64: 3, 1, 32>}, {transform_indices = @transform_15, window_bounds = array<i64: 3, 32, 16>}, {transform_indices = @transform_16, window_bounds = array<i64: 3, 1, 16>}, {pipeline_mode = #tpu.pipeline_mode<synchronous>, transform_indices = @transform_17, window_bounds = array<i64: 1, 1>}, {transform_indices = @transform_18, window_bounds = array<i64: 1, 1, 16>}]} {
    %cst = arith.constant 1.000000e+00 : f32
    %0 = vector.broadcast %cst : f32 to vector<1x16xf32>
    %c0_i32 = arith.constant 0 : i32
    %1 = arith.cmpi eq, %arg1, %c0_i32 : i32
    %2 = arith.extui %1 : i1 to i32
    %c0_i32_0 = arith.constant 0 : i32
    %3 = arith.cmpi ne, %2, %c0_i32_0 : i32
    scf.if %3 {
      %cst_205 = arith.constant 0.000000e+00 : bf16
      %370 = vector.broadcast %cst_205 : bf16 to vector<36x32xbf16>
      %c0_206 = arith.constant 0 : index
      %c0_207 = arith.constant 0 : index
      %371 = vector.load %arg22[%c0_206, %c0_207] : memref<36x32xbf16, #tpu.memory_space<vmem>>, vector<36x32xbf16>
      tpu.vector_store %arg22[%c0_206, %c0_207], %370 {strides = array<i32>} : memref<36x32xbf16, #tpu.memory_space<vmem>>, vector<36x32xbf16>,
      %c0_208 = arith.constant 0 : index
      %c0_209 = arith.constant 0 : index
      %c0_210 = arith.constant 0 : index
      %372 = vector.load %arg2[%c0_208, %c0_209, %c0_210] : memref<1x16x8xf32, #tpu.memory_space<vmem>>, vector<1x16x8xf32>
      %373 = vector.shape_cast %372 : vector<1x16x8xf32> to vector<16x8xf32>
      %c0_211 = arith.constant 0 : index
      %c0_212 = arith.constant 0 : index
      %374 = vector.load %arg3[%c0_211, %c0_212] : memref<1x8xf32, #tpu.memory_space<vmem>>, vector<1x8xf32>
      %c0_213 = arith.constant 0 : index
      %c0_214 = arith.constant 0 : index
      %375 = vector.load %arg4[%c0_213, %c0_214] : memref<1x8xf32, #tpu.memory_space<vmem>>, vector<1x8xf32>
      %cst_215 = arith.constant dense<0.000000e+00> : vector<1x8xf32>
      %376 = tpu.matmul %0, %373, %cst_215 {dimension_numbers = #tpu.dot_dimension_numbers<[1], [0], [0], [1], [0, 0, 1, 1], [], []>} : vector<1x16xf32>, vector<16x8xf32>, vector<1x8xf32> -> vector<1x8xf32>
      %377 = arith.mulf %373, %373 : vector<16x8xf32>
      %cst_216 = arith.constant dense<0.000000e+00> : vector<1x8xf32>
      %378 = tpu.matmul %0, %377, %cst_216 {dimension_numbers = #tpu.dot_dimension_numbers<[1], [0], [0], [1], [0, 0, 1, 1], [], []>} : vector<1x16xf32>, vector<16x8xf32>, vector<1x8xf32> -> vector<1x8xf32>
      %379 = vector.shape_cast %376 : vector<1x8xf32> to vector<1x1x8xf32>
      %cst_217 = arith.constant dense<0.000000e+00> : vector<1xf32>
      %380 = vector.multi_reduction <add>, %379, %cst_217 [1, 2] : vector<1x1x8xf32> to vector<1xf32>
      %381 = vector.shape_cast %380 : vector<1xf32> to vector<1x1x1xf32>
      %382 = vector.extract %381[0, 0, 0] : f32 from vector<1x1x1xf32>
      %cst_218 = arith.constant 7.812500e-03 : f32
      %383 = arith.mulf %382, %cst_218 : f32
      %384 = vector.shape_cast %378 : vector<1x8xf32> to vector<1x1x8xf32>
      %cst_219 = arith.constant dense<0.000000e+00> : vector<1xf32>
      %385 = vector.multi_reduction <add>, %384, %cst_219 [1, 2] : vector<1x1x8xf32> to vector<1xf32>
      %386 = vector.shape_cast %385 : vector<1xf32> to vector<1x1x1xf32>
      %387 = vector.extract %386[0, 0, 0] : f32 from vector<1x1x1xf32>
      %cst_220 = arith.constant 7.812500e-03 : f32
      %388 = arith.mulf %387, %cst_220 : f32
      %389 = arith.mulf %383, %383 : f32
      %390 = arith.subf %388, %389 : f32
      %cst_221 = arith.constant 0.000000e+00 : f32
      %391 = arith.maximumf %390, %cst_221 : f32
      %cst_222 = arith.constant 9.99999993E-9 : f32
      %392 = arith.addf %391, %cst_222 : f32
      %393 = math.rsqrt %392 : f32
      %394 = vector.broadcast %383 : f32 to vector<16x8xf32>
      %395 = arith.subf %373, %394 : vector<16x8xf32>
      %396 = vector.broadcast %393 : f32 to vector<16x8xf32>
      %397 = arith.mulf %395, %396 : vector<16x8xf32>
      %398 = vector.broadcast %374 : vector<1x8xf32> to vector<16x8xf32>
      %399 = arith.mulf %398, %397 : vector<16x8xf32>
      %400 = vector.broadcast %375 : vector<1x8xf32> to vector<16x8xf32>
      %401 = arith.addf %399, %400 : vector<16x8xf32>
      %402 = arith.truncf %401 : vector<16x8xf32> to vector<16x8xbf16>
      %c0_223 = arith.constant 0 : index
      %c0_224 = arith.constant 0 : index
      %403 = vector.load %arg5[%c0_223, %c0_224] : memref<8x16xbf16, #tpu.memory_space<vmem>>, vector<8x16xbf16>
      %cst_225 = arith.constant dense<0.000000e+00> : vector<16x16xf32>
      %404 = tpu.matmul %402, %403, %cst_225 {dimension_numbers = #tpu.dot_dimension_numbers<[1], [0], [0], [1], [0, 0, 1, 1], [], []>} : vector<16x8xbf16>, vector<8x16xbf16>, vector<16x16xf32> -> vector<16x16xf32>
      %c0_226 = arith.constant 0 : index
      %c0_227 = arith.constant 0 : index
      %405 = vector.load %arg6[%c0_226, %c0_227] : memref<1x16xf32, #tpu.memory_space<vmem>>, vector<1x16xf32>
      %406 = vector.broadcast %405 : vector<1x16xf32> to vector<16x16xf32>
      %407 = arith.addf %404, %406 : vector<16x16xf32>
      %c0_228 = arith.constant 0 : index
      %c0_229 = arith.constant 0 : index
      %408 = vector.load %arg21[%c0_228, %c0_229] : memref<16x16xf32, #tpu.memory_space<vmem>>, vector<16x16xf32>
      tpu.vector_store %arg21[%c0_228, %c0_229], %407 {strides = array<i32>} : memref<16x16xf32, #tpu.memory_space<vmem>>, vector<16x16xf32>,
    } else {
    }
    %c0 = arith.constant 0 : index
    %c0_1 = arith.constant 0 : index
    %4 = vector.load %arg21[%c0, %c0_1] : memref<16x16xf32, #tpu.memory_space<vmem>>, vector<16x16xf32>
    %5 = arith.truncf %4 : vector<16x16xf32> to vector<16x16xbf16>
    %c0_2 = arith.constant 0 : index
    %c0_3 = arith.constant 0 : index
    %c0_4 = arith.constant 0 : index
    %6 = vector.load %arg7[%c0_2, %c0_3, %c0_4] : memref<3x16x32xbf16, #tpu.memory_space<vmem>>, vector<1x16x32xbf16>
    %7 = vector.shape_cast %6 : vector<1x16x32xbf16> to vector<16x32xbf16>
    %cst_5 = arith.constant dense<0.000000e+00> : vector<16x32xf32>
    %8 = tpu.matmul %5, %7, %cst_5 {dimension_numbers = #tpu.dot_dimension_numbers<[1], [0], [0], [1], [0, 0, 1, 1], [], []>} : vector<16x16xbf16>, vector<16x32xbf16>, vector<16x32xf32> -> vector<16x32xf32>
    %c0_6 = arith.constant 0 : index
    %c0_7 = arith.constant 0 : index
    %c0_8 = arith.constant 0 : index
    %9 = vector.load %arg8[%c0_6, %c0_7, %c0_8] : memref<3x1x32xf32, #tpu.memory_space<vmem>>, vector<1x1x32xf32>
    %10 = vector.shape_cast %9 : vector<1x1x32xf32> to vector<1x32xf32>
    %11 = vector.broadcast %10 : vector<1x32xf32> to vector<16x32xf32>
    %12 = arith.addf %8, %11 : vector<16x32xf32>
    %c0_9 = arith.constant 0 : index
    %c0_10 = arith.constant 0 : index
    %c0_11 = arith.constant 0 : index
    %13 = vector.load %arg9[%c0_9, %c0_10, %c0_11] : memref<3x1x1xf32, #tpu.memory_space<vmem>>, vector<1x1x1xf32>
    %14 = vector.shape_cast %13 : vector<1x1x1xf32> to vector<1x1xf32>
    %cst_12 = arith.constant 0.000000e+00 : f32
    %15 = vector.broadcast %cst_12 : f32 to vector<16x32xf32>
    %16 = arith.cmpf oge, %12, %15 : vector<16x32xf32>
    %17 = vector.broadcast %14 : vector<1x1xf32> to vector<16x32xf32>
    %18 = arith.mulf %17, %12 : vector<16x32xf32>
    %19 = arith.select %16, %12, %18 : vector<16x32xi1>, vector<16x32xf32>
    %c0_13 = arith.constant 0 : index
    %c0_14 = arith.constant 0 : index
    %c0_15 = arith.constant 0 : index
    %20 = vector.load %arg10[%c0_13, %c0_14, %c0_15] : memref<3x1x32xf32, #tpu.memory_space<vmem>>, vector<1x1x32xf32>
    %21 = vector.shape_cast %20 : vector<1x1x32xf32> to vector<1x32xf32>
    %c0_16 = arith.constant 0 : index
    %c0_17 = arith.constant 0 : index
    %c0_18 = arith.constant 0 : index
    %22 = vector.load %arg11[%c0_16, %c0_17, %c0_18] : memref<3x1x32xf32, #tpu.memory_space<vmem>>, vector<1x1x32xf32>
    %23 = vector.shape_cast %22 : vector<1x1x32xf32> to vector<1x32xf32>
    %cst_19 = arith.constant dense<0.000000e+00> : vector<1x32xf32>
    %24 = tpu.matmul %0, %19, %cst_19 {dimension_numbers = #tpu.dot_dimension_numbers<[1], [0], [0], [1], [0, 0, 1, 1], [], []>} : vector<1x16xf32>, vector<16x32xf32>, vector<1x32xf32> -> vector<1x32xf32>
    %25 = arith.mulf %19, %19 : vector<16x32xf32>
    %cst_20 = arith.constant dense<0.000000e+00> : vector<1x32xf32>
    %26 = tpu.matmul %0, %25, %cst_20 {dimension_numbers = #tpu.dot_dimension_numbers<[1], [0], [0], [1], [0, 0, 1, 1], [], []>} : vector<1x16xf32>, vector<16x32xf32>, vector<1x32xf32> -> vector<1x32xf32>
    %27 = vector.shape_cast %24 : vector<1x32xf32> to vector<1x1x32xf32>
    %cst_21 = arith.constant dense<0.000000e+00> : vector<1xf32>
    %28 = vector.multi_reduction <add>, %27, %cst_21 [1, 2] : vector<1x1x32xf32> to vector<1xf32>
    %29 = vector.shape_cast %28 : vector<1xf32> to vector<1x1x1xf32>
    %30 = vector.extract %29[0, 0, 0] : f32 from vector<1x1x1xf32>
    %cst_22 = arith.constant 0.001953125 : f32
    %31 = arith.mulf %30, %cst_22 : f32
    %32 = vector.shape_cast %26 : vector<1x32xf32> to vector<1x1x32xf32>
    %cst_23 = arith.constant dense<0.000000e+00> : vector<1xf32>
    %33 = vector.multi_reduction <add>, %32, %cst_23 [1, 2] : vector<1x1x32xf32> to vector<1xf32>
    %34 = vector.shape_cast %33 : vector<1xf32> to vector<1x1x1xf32>
    %35 = vector.extract %34[0, 0, 0] : f32 from vector<1x1x1xf32>
    %cst_24 = arith.constant 0.001953125 : f32
    %36 = arith.mulf %35, %cst_24 : f32
    %37 = arith.mulf %31, %31 : f32
    %38 = arith.subf %36, %37 : f32
    %cst_25 = arith.constant 0.000000e+00 : f32
    %39 = arith.maximumf %38, %cst_25 : f32
    %cst_26 = arith.constant 9.99999993E-9 : f32
    %40 = arith.addf %39, %cst_26 : f32
    %41 = math.rsqrt %40 : f32
    %42 = vector.broadcast %31 : f32 to vector<16x32xf32>
    %43 = arith.subf %19, %42 : vector<16x32xf32>
    %44 = vector.broadcast %41 : f32 to vector<16x32xf32>
    %45 = arith.mulf %43, %44 : vector<16x32xf32>
    %46 = vector.broadcast %21 : vector<1x32xf32> to vector<16x32xf32>
    %47 = arith.mulf %46, %45 : vector<16x32xf32>
    %48 = vector.broadcast %23 : vector<1x32xf32> to vector<16x32xf32>
    %49 = arith.addf %47, %48 : vector<16x32xf32>
    %50 = arith.truncf %49 : vector<16x32xf32> to vector<16x32xbf16>
    %c16 = arith.constant 16 : index
    %c0_27 = arith.constant 0 : index
    %51 = vector.load %arg22[%c16, %c0_27] : memref<36x32xbf16, #tpu.memory_space<vmem>>, vector<16x32xbf16>
    tpu.vector_store %arg22[%c16, %c0_27], %50 {strides = array<i32>} : memref<36x32xbf16, #tpu.memory_space<vmem>>, vector<16x32xbf16>,
    %c0_28 = arith.constant 0 : index
    %c0_29 = arith.constant 0 : index
    %c0_30 = arith.constant 0 : index
    %52 = vector.load %arg12[%c0_28, %c0_29, %c0_30] : memref<3x3x32xf32, #tpu.memory_space<vmem>>, vector<1x3x32xf32>
    %53 = vector.shape_cast %52 : vector<1x3x32xf32> to vector<3x32xf32>
    %cst_31 = arith.constant 0.000000e+00 : f32
    %54 = vector.broadcast %cst_31 : f32 to vector<16x32xf32>
    %55 = vector.extract_strided_slice %53 {offsets = [0, 0], sizes = [1, 32], strides = [1, 1]} : vector<3x32xf32> to vector<1x32xf32>
    %c15 = arith.constant 15 : index
    %c0_32 = arith.constant 0 : index
    %56 = vector.load %arg22[%c15, %c0_32] : memref<36x32xbf16, #tpu.memory_space<vmem>>, vector<16x32xbf16>
    %57 = arith.extf %56 : vector<16x32xbf16> to vector<16x32xf32>
    %58 = vector.broadcast %55 : vector<1x32xf32> to vector<16x32xf32>
    %59 = arith.mulf %58, %57 : vector<16x32xf32>
    %60 = arith.addf %54, %59 : vector<16x32xf32>
    %61 = vector.extract_strided_slice %53 {offsets = [1, 0], sizes = [1, 32], strides = [1, 1]} : vector<3x32xf32> to vector<1x32xf32>
    %c16_33 = arith.constant 16 : index
    %c0_34 = arith.constant 0 : index
    %62 = vector.load %arg22[%c16_33, %c0_34] : memref<36x32xbf16, #tpu.memory_space<vmem>>, vector<16x32xbf16>
    %63 = arith.extf %62 : vector<16x32xbf16> to vector<16x32xf32>
    %64 = vector.broadcast %61 : vector<1x32xf32> to vector<16x32xf32>
    %65 = arith.mulf %64, %63 : vector<16x32xf32>
    %66 = arith.addf %60, %65 : vector<16x32xf32>
    %67 = vector.extract_strided_slice %53 {offsets = [2, 0], sizes = [1, 32], strides = [1, 1]} : vector<3x32xf32> to vector<1x32xf32>
    %c17 = arith.constant 17 : index
    %c0_35 = arith.constant 0 : index
    %68 = vector.load %arg22[%c17, %c0_35] : memref<36x32xbf16, #tpu.memory_space<vmem>>, vector<16x32xbf16>
    %69 = arith.extf %68 : vector<16x32xbf16> to vector<16x32xf32>
    %70 = vector.broadcast %67 : vector<1x32xf32> to vector<16x32xf32>
    %71 = arith.mulf %70, %69 : vector<16x32xf32>
    %72 = arith.addf %66, %71 : vector<16x32xf32>
    %c0_36 = arith.constant 0 : index
    %c0_37 = arith.constant 0 : index
    %c0_38 = arith.constant 0 : index
    %73 = vector.load %arg13[%c0_36, %c0_37, %c0_38] : memref<3x1x32xf32, #tpu.memory_space<vmem>>, vector<1x1x32xf32>
    %74 = vector.shape_cast %73 : vector<1x1x32xf32> to vector<1x32xf32>
    %75 = vector.broadcast %74 : vector<1x32xf32> to vector<16x32xf32>
    %76 = arith.addf %72, %75 : vector<16x32xf32>
    %c0_39 = arith.constant 0 : index
    %c0_40 = arith.constant 0 : index
    %c0_41 = arith.constant 0 : index
    %77 = vector.load %arg14[%c0_39, %c0_40, %c0_41] : memref<3x1x1xf32, #tpu.memory_space<vmem>>, vector<1x1x1xf32>
    %78 = vector.shape_cast %77 : vector<1x1x1xf32> to vector<1x1xf32>
    %cst_42 = arith.constant 0.000000e+00 : f32
    %79 = vector.broadcast %cst_42 : f32 to vector<16x32xf32>
    %80 = arith.cmpf oge, %76, %79 : vector<16x32xf32>
    %81 = vector.broadcast %78 : vector<1x1xf32> to vector<16x32xf32>
    %82 = arith.mulf %81, %76 : vector<16x32xf32>
    %83 = arith.select %80, %76, %82 : vector<16x32xi1>, vector<16x32xf32>
    %c0_43 = arith.constant 0 : index
    %c0_44 = arith.constant 0 : index
    %c0_45 = arith.constant 0 : index
    %84 = vector.load %arg15[%c0_43, %c0_44, %c0_45] : memref<3x1x32xf32, #tpu.memory_space<vmem>>, vector<1x1x32xf32>
    %85 = vector.shape_cast %84 : vector<1x1x32xf32> to vector<1x32xf32>
    %c0_46 = arith.constant 0 : index
    %c0_47 = arith.constant 0 : index
    %c0_48 = arith.constant 0 : index
    %86 = vector.load %arg16[%c0_46, %c0_47, %c0_48] : memref<3x1x32xf32, #tpu.memory_space<vmem>>, vector<1x1x32xf32>
    %87 = vector.shape_cast %86 : vector<1x1x32xf32> to vector<1x32xf32>
    %cst_49 = arith.constant dense<0.000000e+00> : vector<1x32xf32>
    %88 = tpu.matmul %0, %83, %cst_49 {dimension_numbers = #tpu.dot_dimension_numbers<[1], [0], [0], [1], [0, 0, 1, 1], [], []>} : vector<1x16xf32>, vector<16x32xf32>, vector<1x32xf32> -> vector<1x32xf32>
    %89 = arith.mulf %83, %83 : vector<16x32xf32>
    %cst_50 = arith.constant dense<0.000000e+00> : vector<1x32xf32>
    %90 = tpu.matmul %0, %89, %cst_50 {dimension_numbers = #tpu.dot_dimension_numbers<[1], [0], [0], [1], [0, 0, 1, 1], [], []>} : vector<1x16xf32>, vector<16x32xf32>, vector<1x32xf32> -> vector<1x32xf32>
    %91 = vector.shape_cast %88 : vector<1x32xf32> to vector<1x1x32xf32>
    %cst_51 = arith.constant dense<0.000000e+00> : vector<1xf32>
    %92 = vector.multi_reduction <add>, %91, %cst_51 [1, 2] : vector<1x1x32xf32> to vector<1xf32>
    %93 = vector.shape_cast %92 : vector<1xf32> to vector<1x1x1xf32>
    %94 = vector.extract %93[0, 0, 0] : f32 from vector<1x1x1xf32>
    %cst_52 = arith.constant 0.001953125 : f32
    %95 = arith.mulf %94, %cst_52 : f32
    %96 = vector.shape_cast %90 : vector<1x32xf32> to vector<1x1x32xf32>
    %cst_53 = arith.constant dense<0.000000e+00> : vector<1xf32>
    %97 = vector.multi_reduction <add>, %96, %cst_53 [1, 2] : vector<1x1x32xf32> to vector<1xf32>
    %98 = vector.shape_cast %97 : vector<1xf32> to vector<1x1x1xf32>
    %99 = vector.extract %98[0, 0, 0] : f32 from vector<1x1x1xf32>
    %cst_54 = arith.constant 0.001953125 : f32
    %100 = arith.mulf %99, %cst_54 : f32
    %101 = arith.mulf %95, %95 : f32
    %102 = arith.subf %100, %101 : f32
    %cst_55 = arith.constant 0.000000e+00 : f32
    %103 = arith.maximumf %102, %cst_55 : f32
    %cst_56 = arith.constant 9.99999993E-9 : f32
    %104 = arith.addf %103, %cst_56 : f32
    %105 = math.rsqrt %104 : f32
    %106 = vector.broadcast %95 : f32 to vector<16x32xf32>
    %107 = arith.subf %83, %106 : vector<16x32xf32>
    %108 = vector.broadcast %105 : f32 to vector<16x32xf32>
    %109 = arith.mulf %107, %108 : vector<16x32xf32>
    %110 = vector.broadcast %85 : vector<1x32xf32> to vector<16x32xf32>
    %111 = arith.mulf %110, %109 : vector<16x32xf32>
    %112 = vector.broadcast %87 : vector<1x32xf32> to vector<16x32xf32>
    %113 = arith.addf %111, %112 : vector<16x32xf32>
    %114 = arith.truncf %113 : vector<16x32xf32> to vector<16x32xbf16>
    %c0_57 = arith.constant 0 : index
    %c0_58 = arith.constant 0 : index
    %c0_59 = arith.constant 0 : index
    %115 = vector.load %arg17[%c0_57, %c0_58, %c0_59] : memref<3x32x16xbf16, #tpu.memory_space<vmem>>, vector<1x32x16xbf16>
    %116 = vector.shape_cast %115 : vector<1x32x16xbf16> to vector<32x16xbf16>
    %cst_60 = arith.constant dense<0.000000e+00> : vector<16x16xf32>
    %117 = tpu.matmul %114, %116, %cst_60 {dimension_numbers = #tpu.dot_dimension_numbers<[1], [0], [0], [1], [0, 0, 1, 1], [], []>} : vector<16x32xbf16>, vector<32x16xbf16>, vector<16x16xf32> -> vector<16x16xf32>
    %c0_61 = arith.constant 0 : index
    %c0_62 = arith.constant 0 : index
    %c0_63 = arith.constant 0 : index
    %118 = vector.load %arg18[%c0_61, %c0_62, %c0_63] : memref<3x1x16xf32, #tpu.memory_space<vmem>>, vector<1x1x16xf32>
    %119 = vector.shape_cast %118 : vector<1x1x16xf32> to vector<1x16xf32>
    %120 = vector.broadcast %119 : vector<1x16xf32> to vector<16x16xf32>
    %121 = arith.addf %117, %120 : vector<16x16xf32>
    %c0_64 = arith.constant 0 : index
    %c0_65 = arith.constant 0 : index
    %122 = vector.load %arg21[%c0_64, %c0_65] : memref<16x16xf32, #tpu.memory_space<vmem>>, vector<16x16xf32>
    %123 = arith.addf %122, %121 : vector<16x16xf32>
    %c0_66 = arith.constant 0 : index
    %c0_67 = arith.constant 0 : index
    %124 = vector.load %arg21[%c0_66, %c0_67] : memref<16x16xf32, #tpu.memory_space<vmem>>, vector<16x16xf32>
    tpu.vector_store %arg21[%c0_66, %c0_67], %123 {strides = array<i32>} : memref<16x16xf32, #tpu.memory_space<vmem>>, vector<16x16xf32>,
    %c0_68 = arith.constant 0 : index
    %c0_69 = arith.constant 0 : index
    %125 = vector.load %arg21[%c0_68, %c0_69] : memref<16x16xf32, #tpu.memory_space<vmem>>, vector<16x16xf32>
    %126 = arith.truncf %125 : vector<16x16xf32> to vector<16x16xbf16>
    %c1 = arith.constant 1 : index
    %c0_70 = arith.constant 0 : index
    %c0_71 = arith.constant 0 : index
    %127 = vector.load %arg7[%c1, %c0_70, %c0_71] : memref<3x16x32xbf16, #tpu.memory_space<vmem>>, vector<1x16x32xbf16>
    %128 = vector.shape_cast %127 : vector<1x16x32xbf16> to vector<16x32xbf16>
    %cst_72 = arith.constant dense<0.000000e+00> : vector<16x32xf32>
    %129 = tpu.matmul %126, %128, %cst_72 {dimension_numbers = #tpu.dot_dimension_numbers<[1], [0], [0], [1], [0, 0, 1, 1], [], []>} : vector<16x16xbf16>, vector<16x32xbf16>, vector<16x32xf32> -> vector<16x32xf32>
    %c1_73 = arith.constant 1 : index
    %c0_74 = arith.constant 0 : index
    %c0_75 = arith.constant 0 : index
    %130 = vector.load %arg8[%c1_73, %c0_74, %c0_75] : memref<3x1x32xf32, #tpu.memory_space<vmem>>, vector<1x1x32xf32>
    %131 = vector.shape_cast %130 : vector<1x1x32xf32> to vector<1x32xf32>
    %132 = vector.broadcast %131 : vector<1x32xf32> to vector<16x32xf32>
    %133 = arith.addf %129, %132 : vector<16x32xf32>
    %c1_76 = arith.constant 1 : index
    %c0_77 = arith.constant 0 : index
    %c0_78 = arith.constant 0 : index
    %134 = vector.load %arg9[%c1_76, %c0_77, %c0_78] : memref<3x1x1xf32, #tpu.memory_space<vmem>>, vector<1x1x1xf32>
    %135 = vector.shape_cast %134 : vector<1x1x1xf32> to vector<1x1xf32>
    %cst_79 = arith.constant 0.000000e+00 : f32
    %136 = vector.broadcast %cst_79 : f32 to vector<16x32xf32>
    %137 = arith.cmpf oge, %133, %136 : vector<16x32xf32>
    %138 = vector.broadcast %135 : vector<1x1xf32> to vector<16x32xf32>
    %139 = arith.mulf %138, %133 : vector<16x32xf32>
    %140 = arith.select %137, %133, %139 : vector<16x32xi1>, vector<16x32xf32>
    %c1_80 = arith.constant 1 : index
    %c0_81 = arith.constant 0 : index
    %c0_82 = arith.constant 0 : index
    %141 = vector.load %arg10[%c1_80, %c0_81, %c0_82] : memref<3x1x32xf32, #tpu.memory_space<vmem>>, vector<1x1x32xf32>
    %142 = vector.shape_cast %141 : vector<1x1x32xf32> to vector<1x32xf32>
    %c1_83 = arith.constant 1 : index
    %c0_84 = arith.constant 0 : index
    %c0_85 = arith.constant 0 : index
    %143 = vector.load %arg11[%c1_83, %c0_84, %c0_85] : memref<3x1x32xf32, #tpu.memory_space<vmem>>, vector<1x1x32xf32>
    %144 = vector.shape_cast %143 : vector<1x1x32xf32> to vector<1x32xf32>
    %cst_86 = arith.constant dense<0.000000e+00> : vector<1x32xf32>
    %145 = tpu.matmul %0, %140, %cst_86 {dimension_numbers = #tpu.dot_dimension_numbers<[1], [0], [0], [1], [0, 0, 1, 1], [], []>} : vector<1x16xf32>, vector<16x32xf32>, vector<1x32xf32> -> vector<1x32xf32>
    %146 = arith.mulf %140, %140 : vector<16x32xf32>
    %cst_87 = arith.constant dense<0.000000e+00> : vector<1x32xf32>
    %147 = tpu.matmul %0, %146, %cst_87 {dimension_numbers = #tpu.dot_dimension_numbers<[1], [0], [0], [1], [0, 0, 1, 1], [], []>} : vector<1x16xf32>, vector<16x32xf32>, vector<1x32xf32> -> vector<1x32xf32>
    %148 = vector.shape_cast %145 : vector<1x32xf32> to vector<1x1x32xf32>
    %cst_88 = arith.constant dense<0.000000e+00> : vector<1xf32>
    %149 = vector.multi_reduction <add>, %148, %cst_88 [1, 2] : vector<1x1x32xf32> to vector<1xf32>
    %150 = vector.shape_cast %149 : vector<1xf32> to vector<1x1x1xf32>
    %151 = vector.extract %150[0, 0, 0] : f32 from vector<1x1x1xf32>
    %cst_89 = arith.constant 0.001953125 : f32
    %152 = arith.mulf %151, %cst_89 : f32
    %153 = vector.shape_cast %147 : vector<1x32xf32> to vector<1x1x32xf32>
    %cst_90 = arith.constant dense<0.000000e+00> : vector<1xf32>
    %154 = vector.multi_reduction <add>, %153, %cst_90 [1, 2] : vector<1x1x32xf32> to vector<1xf32>
    %155 = vector.shape_cast %154 : vector<1xf32> to vector<1x1x1xf32>
    %156 = vector.extract %155[0, 0, 0] : f32 from vector<1x1x1xf32>
    %cst_91 = arith.constant 0.001953125 : f32
    %157 = arith.mulf %156, %cst_91 : f32
    %158 = arith.mulf %152, %152 : f32
    %159 = arith.subf %157, %158 : f32
    %cst_92 = arith.constant 0.000000e+00 : f32
    %160 = arith.maximumf %159, %cst_92 : f32
    %cst_93 = arith.constant 9.99999993E-9 : f32
    %161 = arith.addf %160, %cst_93 : f32
    %162 = math.rsqrt %161 : f32
    %163 = vector.broadcast %152 : f32 to vector<16x32xf32>
    %164 = arith.subf %140, %163 : vector<16x32xf32>
    %165 = vector.broadcast %162 : f32 to vector<16x32xf32>
    %166 = arith.mulf %164, %165 : vector<16x32xf32>
    %167 = vector.broadcast %142 : vector<1x32xf32> to vector<16x32xf32>
    %168 = arith.mulf %167, %166 : vector<16x32xf32>
    %169 = vector.broadcast %144 : vector<1x32xf32> to vector<16x32xf32>
    %170 = arith.addf %168, %169 : vector<16x32xf32>
    %171 = arith.truncf %170 : vector<16x32xf32> to vector<16x32xbf16>
    %c16_94 = arith.constant 16 : index
    %c0_95 = arith.constant 0 : index
    %172 = vector.load %arg22[%c16_94, %c0_95] : memref<36x32xbf16, #tpu.memory_space<vmem>>, vector<16x32xbf16>
    tpu.vector_store %arg22[%c16_94, %c0_95], %171 {strides = array<i32>} : memref<36x32xbf16, #tpu.memory_space<vmem>>, vector<16x32xbf16>,
    %c1_96 = arith.constant 1 : index
    %c0_97 = arith.constant 0 : index
    %c0_98 = arith.constant 0 : index
    %173 = vector.load %arg12[%c1_96, %c0_97, %c0_98] : memref<3x3x32xf32, #tpu.memory_space<vmem>>, vector<1x3x32xf32>
    %174 = vector.shape_cast %173 : vector<1x3x32xf32> to vector<3x32xf32>
    %cst_99 = arith.constant 0.000000e+00 : f32
    %175 = vector.broadcast %cst_99 : f32 to vector<16x32xf32>
    %176 = vector.extract_strided_slice %174 {offsets = [0, 0], sizes = [1, 32], strides = [1, 1]} : vector<3x32xf32> to vector<1x32xf32>
    %c14 = arith.constant 14 : index
    %c0_100 = arith.constant 0 : index
    %177 = vector.load %arg22[%c14, %c0_100] : memref<36x32xbf16, #tpu.memory_space<vmem>>, vector<16x32xbf16>
    %178 = arith.extf %177 : vector<16x32xbf16> to vector<16x32xf32>
    %179 = vector.broadcast %176 : vector<1x32xf32> to vector<16x32xf32>
    %180 = arith.mulf %179, %178 : vector<16x32xf32>
    %181 = arith.addf %175, %180 : vector<16x32xf32>
    %182 = vector.extract_strided_slice %174 {offsets = [1, 0], sizes = [1, 32], strides = [1, 1]} : vector<3x32xf32> to vector<1x32xf32>
    %c16_101 = arith.constant 16 : index
    %c0_102 = arith.constant 0 : index
    %183 = vector.load %arg22[%c16_101, %c0_102] : memref<36x32xbf16, #tpu.memory_space<vmem>>, vector<16x32xbf16>
    %184 = arith.extf %183 : vector<16x32xbf16> to vector<16x32xf32>
    %185 = vector.broadcast %182 : vector<1x32xf32> to vector<16x32xf32>
    %186 = arith.mulf %185, %184 : vector<16x32xf32>
    %187 = arith.addf %181, %186 : vector<16x32xf32>
    %188 = vector.extract_strided_slice %174 {offsets = [2, 0], sizes = [1, 32], strides = [1, 1]} : vector<3x32xf32> to vector<1x32xf32>
    %c18 = arith.constant 18 : index
    %c0_103 = arith.constant 0 : index
    %189 = vector.load %arg22[%c18, %c0_103] : memref<36x32xbf16, #tpu.memory_space<vmem>>, vector<16x32xbf16>
    %190 = arith.extf %189 : vector<16x32xbf16> to vector<16x32xf32>
    %191 = vector.broadcast %188 : vector<1x32xf32> to vector<16x32xf32>
    %192 = arith.mulf %191, %190 : vector<16x32xf32>
    %193 = arith.addf %187, %192 : vector<16x32xf32>
    %c1_104 = arith.constant 1 : index
    %c0_105 = arith.constant 0 : index
    %c0_106 = arith.constant 0 : index
    %194 = vector.load %arg13[%c1_104, %c0_105, %c0_106] : memref<3x1x32xf32, #tpu.memory_space<vmem>>, vector<1x1x32xf32>
    %195 = vector.shape_cast %194 : vector<1x1x32xf32> to vector<1x32xf32>
    %196 = vector.broadcast %195 : vector<1x32xf32> to vector<16x32xf32>
    %197 = arith.addf %193, %196 : vector<16x32xf32>
    %c1_107 = arith.constant 1 : index
    %c0_108 = arith.constant 0 : index
    %c0_109 = arith.constant 0 : index
    %198 = vector.load %arg14[%c1_107, %c0_108, %c0_109] : memref<3x1x1xf32, #tpu.memory_space<vmem>>, vector<1x1x1xf32>
    %199 = vector.shape_cast %198 : vector<1x1x1xf32> to vector<1x1xf32>
    %cst_110 = arith.constant 0.000000e+00 : f32
    %200 = vector.broadcast %cst_110 : f32 to vector<16x32xf32>
    %201 = arith.cmpf oge, %197, %200 : vector<16x32xf32>
    %202 = vector.broadcast %199 : vector<1x1xf32> to vector<16x32xf32>
    %203 = arith.mulf %202, %197 : vector<16x32xf32>
    %204 = arith.select %201, %197, %203 : vector<16x32xi1>, vector<16x32xf32>
    %c1_111 = arith.constant 1 : index
    %c0_112 = arith.constant 0 : index
    %c0_113 = arith.constant 0 : index
    %205 = vector.load %arg15[%c1_111, %c0_112, %c0_113] : memref<3x1x32xf32, #tpu.memory_space<vmem>>, vector<1x1x32xf32>
    %206 = vector.shape_cast %205 : vector<1x1x32xf32> to vector<1x32xf32>
    %c1_114 = arith.constant 1 : index
    %c0_115 = arith.constant 0 : index
    %c0_116 = arith.constant 0 : index
    %207 = vector.load %arg16[%c1_114, %c0_115, %c0_116] : memref<3x1x32xf32, #tpu.memory_space<vmem>>, vector<1x1x32xf32>
    %208 = vector.shape_cast %207 : vector<1x1x32xf32> to vector<1x32xf32>
    %cst_117 = arith.constant dense<0.000000e+00> : vector<1x32xf32>
    %209 = tpu.matmul %0, %204, %cst_117 {dimension_numbers = #tpu.dot_dimension_numbers<[1], [0], [0], [1], [0, 0, 1, 1], [], []>} : vector<1x16xf32>, vector<16x32xf32>, vector<1x32xf32> -> vector<1x32xf32>
    %210 = arith.mulf %204, %204 : vector<16x32xf32>
    %cst_118 = arith.constant dense<0.000000e+00> : vector<1x32xf32>
    %211 = tpu.matmul %0, %210, %cst_118 {dimension_numbers = #tpu.dot_dimension_numbers<[1], [0], [0], [1], [0, 0, 1, 1], [], []>} : vector<1x16xf32>, vector<16x32xf32>, vector<1x32xf32> -> vector<1x32xf32>
    %212 = vector.shape_cast %209 : vector<1x32xf32> to vector<1x1x32xf32>
    %cst_119 = arith.constant dense<0.000000e+00> : vector<1xf32>
    %213 = vector.multi_reduction <add>, %212, %cst_119 [1, 2] : vector<1x1x32xf32> to vector<1xf32>
    %214 = vector.shape_cast %213 : vector<1xf32> to vector<1x1x1xf32>
    %215 = vector.extract %214[0, 0, 0] : f32 from vector<1x1x1xf32>
    %cst_120 = arith.constant 0.001953125 : f32
    %216 = arith.mulf %215, %cst_120 : f32
    %217 = vector.shape_cast %211 : vector<1x32xf32> to vector<1x1x32xf32>
    %cst_121 = arith.constant dense<0.000000e+00> : vector<1xf32>
    %218 = vector.multi_reduction <add>, %217, %cst_121 [1, 2] : vector<1x1x32xf32> to vector<1xf32>
    %219 = vector.shape_cast %218 : vector<1xf32> to vector<1x1x1xf32>
    %220 = vector.extract %219[0, 0, 0] : f32 from vector<1x1x1xf32>
    %cst_122 = arith.constant 0.001953125 : f32
    %221 = arith.mulf %220, %cst_122 : f32
    %222 = arith.mulf %216, %216 : f32
    %223 = arith.subf %221, %222 : f32
    %cst_123 = arith.constant 0.000000e+00 : f32
    %224 = arith.maximumf %223, %cst_123 : f32
    %cst_124 = arith.constant 9.99999993E-9 : f32
    %225 = arith.addf %224, %cst_124 : f32
    %226 = math.rsqrt %225 : f32
    %227 = vector.broadcast %216 : f32 to vector<16x32xf32>
    %228 = arith.subf %204, %227 : vector<16x32xf32>
    %229 = vector.broadcast %226 : f32 to vector<16x32xf32>
    %230 = arith.mulf %228, %229 : vector<16x32xf32>
    %231 = vector.broadcast %206 : vector<1x32xf32> to vector<16x32xf32>
    %232 = arith.mulf %231, %230 : vector<16x32xf32>
    %233 = vector.broadcast %208 : vector<1x32xf32> to vector<16x32xf32>
    %234 = arith.addf %232, %233 : vector<16x32xf32>
    %235 = arith.truncf %234 : vector<16x32xf32> to vector<16x32xbf16>
    %c1_125 = arith.constant 1 : index
    %c0_126 = arith.constant 0 : index
    %c0_127 = arith.constant 0 : index
    %236 = vector.load %arg17[%c1_125, %c0_126, %c0_127] : memref<3x32x16xbf16, #tpu.memory_space<vmem>>, vector<1x32x16xbf16>
    %237 = vector.shape_cast %236 : vector<1x32x16xbf16> to vector<32x16xbf16>
    %cst_128 = arith.constant dense<0.000000e+00> : vector<16x16xf32>
    %238 = tpu.matmul %235, %237, %cst_128 {dimension_numbers = #tpu.dot_dimension_numbers<[1], [0], [0], [1], [0, 0, 1, 1], [], []>} : vector<16x32xbf16>, vector<32x16xbf16>, vector<16x16xf32> -> vector<16x16xf32>
    %c1_129 = arith.constant 1 : index
    %c0_130 = arith.constant 0 : index
    %c0_131 = arith.constant 0 : index
    %239 = vector.load %arg18[%c1_129, %c0_130, %c0_131] : memref<3x1x16xf32, #tpu.memory_space<vmem>>, vector<1x1x16xf32>
    %240 = vector.shape_cast %239 : vector<1x1x16xf32> to vector<1x16xf32>
    %241 = vector.broadcast %240 : vector<1x16xf32> to vector<16x16xf32>
    %242 = arith.addf %238, %241 : vector<16x16xf32>
    %c0_132 = arith.constant 0 : index
    %c0_133 = arith.constant 0 : index
    %243 = vector.load %arg21[%c0_132, %c0_133] : memref<16x16xf32, #tpu.memory_space<vmem>>, vector<16x16xf32>
    %244 = arith.addf %243, %242 : vector<16x16xf32>
    %c0_134 = arith.constant 0 : index
    %c0_135 = arith.constant 0 : index
    %245 = vector.load %arg21[%c0_134, %c0_135] : memref<16x16xf32, #tpu.memory_space<vmem>>, vector<16x16xf32>
    tpu.vector_store %arg21[%c0_134, %c0_135], %244 {strides = array<i32>} : memref<16x16xf32, #tpu.memory_space<vmem>>, vector<16x16xf32>,
    %c0_136 = arith.constant 0 : index
    %c0_137 = arith.constant 0 : index
    %246 = vector.load %arg21[%c0_136, %c0_137] : memref<16x16xf32, #tpu.memory_space<vmem>>, vector<16x16xf32>
    %247 = arith.truncf %246 : vector<16x16xf32> to vector<16x16xbf16>
    %c2 = arith.constant 2 : index
    %c0_138 = arith.constant 0 : index
    %c0_139 = arith.constant 0 : index
    %248 = vector.load %arg7[%c2, %c0_138, %c0_139] : memref<3x16x32xbf16, #tpu.memory_space<vmem>>, vector<1x16x32xbf16>
    %249 = vector.shape_cast %248 : vector<1x16x32xbf16> to vector<16x32xbf16>
    %cst_140 = arith.constant dense<0.000000e+00> : vector<16x32xf32>
    %250 = tpu.matmul %247, %249, %cst_140 {dimension_numbers = #tpu.dot_dimension_numbers<[1], [0], [0], [1], [0, 0, 1, 1], [], []>} : vector<16x16xbf16>, vector<16x32xbf16>, vector<16x32xf32> -> vector<16x32xf32>
    %c2_141 = arith.constant 2 : index
    %c0_142 = arith.constant 0 : index
    %c0_143 = arith.constant 0 : index
    %251 = vector.load %arg8[%c2_141, %c0_142, %c0_143] : memref<3x1x32xf32, #tpu.memory_space<vmem>>, vector<1x1x32xf32>
    %252 = vector.shape_cast %251 : vector<1x1x32xf32> to vector<1x32xf32>
    %253 = vector.broadcast %252 : vector<1x32xf32> to vector<16x32xf32>
    %254 = arith.addf %250, %253 : vector<16x32xf32>
    %c2_144 = arith.constant 2 : index
    %c0_145 = arith.constant 0 : index
    %c0_146 = arith.constant 0 : index
    %255 = vector.load %arg9[%c2_144, %c0_145, %c0_146] : memref<3x1x1xf32, #tpu.memory_space<vmem>>, vector<1x1x1xf32>
    %256 = vector.shape_cast %255 : vector<1x1x1xf32> to vector<1x1xf32>
    %cst_147 = arith.constant 0.000000e+00 : f32
    %257 = vector.broadcast %cst_147 : f32 to vector<16x32xf32>
    %258 = arith.cmpf oge, %254, %257 : vector<16x32xf32>
    %259 = vector.broadcast %256 : vector<1x1xf32> to vector<16x32xf32>
    %260 = arith.mulf %259, %254 : vector<16x32xf32>
    %261 = arith.select %258, %254, %260 : vector<16x32xi1>, vector<16x32xf32>
    %c2_148 = arith.constant 2 : index
    %c0_149 = arith.constant 0 : index
    %c0_150 = arith.constant 0 : index
    %262 = vector.load %arg10[%c2_148, %c0_149, %c0_150] : memref<3x1x32xf32, #tpu.memory_space<vmem>>, vector<1x1x32xf32>
    %263 = vector.shape_cast %262 : vector<1x1x32xf32> to vector<1x32xf32>
    %c2_151 = arith.constant 2 : index
    %c0_152 = arith.constant 0 : index
    %c0_153 = arith.constant 0 : index
    %264 = vector.load %arg11[%c2_151, %c0_152, %c0_153] : memref<3x1x32xf32, #tpu.memory_space<vmem>>, vector<1x1x32xf32>
    %265 = vector.shape_cast %264 : vector<1x1x32xf32> to vector<1x32xf32>
    %cst_154 = arith.constant dense<0.000000e+00> : vector<1x32xf32>
    %266 = tpu.matmul %0, %261, %cst_154 {dimension_numbers = #tpu.dot_dimension_numbers<[1], [0], [0], [1], [0, 0, 1, 1], [], []>} : vector<1x16xf32>, vector<16x32xf32>, vector<1x32xf32> -> vector<1x32xf32>
    %267 = arith.mulf %261, %261 : vector<16x32xf32>
    %cst_155 = arith.constant dense<0.000000e+00> : vector<1x32xf32>
    %268 = tpu.matmul %0, %267, %cst_155 {dimension_numbers = #tpu.dot_dimension_numbers<[1], [0], [0], [1], [0, 0, 1, 1], [], []>} : vector<1x16xf32>, vector<16x32xf32>, vector<1x32xf32> -> vector<1x32xf32>
    %269 = vector.shape_cast %266 : vector<1x32xf32> to vector<1x1x32xf32>
    %cst_156 = arith.constant dense<0.000000e+00> : vector<1xf32>
    %270 = vector.multi_reduction <add>, %269, %cst_156 [1, 2] : vector<1x1x32xf32> to vector<1xf32>
    %271 = vector.shape_cast %270 : vector<1xf32> to vector<1x1x1xf32>
    %272 = vector.extract %271[0, 0, 0] : f32 from vector<1x1x1xf32>
    %cst_157 = arith.constant 0.001953125 : f32
    %273 = arith.mulf %272, %cst_157 : f32
    %274 = vector.shape_cast %268 : vector<1x32xf32> to vector<1x1x32xf32>
    %cst_158 = arith.constant dense<0.000000e+00> : vector<1xf32>
    %275 = vector.multi_reduction <add>, %274, %cst_158 [1, 2] : vector<1x1x32xf32> to vector<1xf32>
    %276 = vector.shape_cast %275 : vector<1xf32> to vector<1x1x1xf32>
    %277 = vector.extract %276[0, 0, 0] : f32 from vector<1x1x1xf32>
    %cst_159 = arith.constant 0.001953125 : f32
    %278 = arith.mulf %277, %cst_159 : f32
    %279 = arith.mulf %273, %273 : f32
    %280 = arith.subf %278, %279 : f32
    %cst_160 = arith.constant 0.000000e+00 : f32
    %281 = arith.maximumf %280, %cst_160 : f32
    %cst_161 = arith.constant 9.99999993E-9 : f32
    %282 = arith.addf %281, %cst_161 : f32
    %283 = math.rsqrt %282 : f32
    %284 = vector.broadcast %273 : f32 to vector<16x32xf32>
    %285 = arith.subf %261, %284 : vector<16x32xf32>
    %286 = vector.broadcast %283 : f32 to vector<16x32xf32>
    %287 = arith.mulf %285, %286 : vector<16x32xf32>
    %288 = vector.broadcast %263 : vector<1x32xf32> to vector<16x32xf32>
    %289 = arith.mulf %288, %287 : vector<16x32xf32>
    %290 = vector.broadcast %265 : vector<1x32xf32> to vector<16x32xf32>
    %291 = arith.addf %289, %290 : vector<16x32xf32>
    %292 = arith.truncf %291 : vector<16x32xf32> to vector<16x32xbf16>
    %c16_162 = arith.constant 16 : index
    %c0_163 = arith.constant 0 : index
    %293 = vector.load %arg22[%c16_162, %c0_163] : memref<36x32xbf16, #tpu.memory_space<vmem>>, vector<16x32xbf16>
    tpu.vector_store %arg22[%c16_162, %c0_163], %292 {strides = array<i32>} : memref<36x32xbf16, #tpu.memory_space<vmem>>, vector<16x32xbf16>,
    %c2_164 = arith.constant 2 : index
    %c0_165 = arith.constant 0 : index
    %c0_166 = arith.constant 0 : index
    %294 = vector.load %arg12[%c2_164, %c0_165, %c0_166] : memref<3x3x32xf32, #tpu.memory_space<vmem>>, vector<1x3x32xf32>
    %295 = vector.shape_cast %294 : vector<1x3x32xf32> to vector<3x32xf32>
    %cst_167 = arith.constant 0.000000e+00 : f32
    %296 = vector.broadcast %cst_167 : f32 to vector<16x32xf32>
    %297 = vector.extract_strided_slice %295 {offsets = [0, 0], sizes = [1, 32], strides = [1, 1]} : vector<3x32xf32> to vector<1x32xf32>
    %c12 = arith.constant 12 : index
    %c0_168 = arith.constant 0 : index
    %298 = vector.load %arg22[%c12, %c0_168] : memref<36x32xbf16, #tpu.memory_space<vmem>>, vector<16x32xbf16>
    %299 = arith.extf %298 : vector<16x32xbf16> to vector<16x32xf32>
    %300 = vector.broadcast %297 : vector<1x32xf32> to vector<16x32xf32>
    %301 = arith.mulf %300, %299 : vector<16x32xf32>
    %302 = arith.addf %296, %301 : vector<16x32xf32>
    %303 = vector.extract_strided_slice %295 {offsets = [1, 0], sizes = [1, 32], strides = [1, 1]} : vector<3x32xf32> to vector<1x32xf32>
    %c16_169 = arith.constant 16 : index
    %c0_170 = arith.constant 0 : index
    %304 = vector.load %arg22[%c16_169, %c0_170] : memref<36x32xbf16, #tpu.memory_space<vmem>>, vector<16x32xbf16>
    %305 = arith.extf %304 : vector<16x32xbf16> to vector<16x32xf32>
    %306 = vector.broadcast %303 : vector<1x32xf32> to vector<16x32xf32>
    %307 = arith.mulf %306, %305 : vector<16x32xf32>
    %308 = arith.addf %302, %307 : vector<16x32xf32>
    %309 = vector.extract_strided_slice %295 {offsets = [2, 0], sizes = [1, 32], strides = [1, 1]} : vector<3x32xf32> to vector<1x32xf32>
    %c20 = arith.constant 20 : index
    %c0_171 = arith.constant 0 : index
    %310 = vector.load %arg22[%c20, %c0_171] : memref<36x32xbf16, #tpu.memory_space<vmem>>, vector<16x32xbf16>
    %311 = arith.extf %310 : vector<16x32xbf16> to vector<16x32xf32>
    %312 = vector.broadcast %309 : vector<1x32xf32> to vector<16x32xf32>
    %313 = arith.mulf %312, %311 : vector<16x32xf32>
    %314 = arith.addf %308, %313 : vector<16x32xf32>
    %c2_172 = arith.constant 2 : index
    %c0_173 = arith.constant 0 : index
    %c0_174 = arith.constant 0 : index
    %315 = vector.load %arg13[%c2_172, %c0_173, %c0_174] : memref<3x1x32xf32, #tpu.memory_space<vmem>>, vector<1x1x32xf32>
    %316 = vector.shape_cast %315 : vector<1x1x32xf32> to vector<1x32xf32>
    %317 = vector.broadcast %316 : vector<1x32xf32> to vector<16x32xf32>
    %318 = arith.addf %314, %317 : vector<16x32xf32>
    %c2_175 = arith.constant 2 : index
    %c0_176 = arith.constant 0 : index
    %c0_177 = arith.constant 0 : index
    %319 = vector.load %arg14[%c2_175, %c0_176, %c0_177] : memref<3x1x1xf32, #tpu.memory_space<vmem>>, vector<1x1x1xf32>
    %320 = vector.shape_cast %319 : vector<1x1x1xf32> to vector<1x1xf32>
    %cst_178 = arith.constant 0.000000e+00 : f32
    %321 = vector.broadcast %cst_178 : f32 to vector<16x32xf32>
    %322 = arith.cmpf oge, %318, %321 : vector<16x32xf32>
    %323 = vector.broadcast %320 : vector<1x1xf32> to vector<16x32xf32>
    %324 = arith.mulf %323, %318 : vector<16x32xf32>
    %325 = arith.select %322, %318, %324 : vector<16x32xi1>, vector<16x32xf32>
    %c2_179 = arith.constant 2 : index
    %c0_180 = arith.constant 0 : index
    %c0_181 = arith.constant 0 : index
    %326 = vector.load %arg15[%c2_179, %c0_180, %c0_181] : memref<3x1x32xf32, #tpu.memory_space<vmem>>, vector<1x1x32xf32>
    %327 = vector.shape_cast %326 : vector<1x1x32xf32> to vector<1x32xf32>
    %c2_182 = arith.constant 2 : index
    %c0_183 = arith.constant 0 : index
    %c0_184 = arith.constant 0 : index
    %328 = vector.load %arg16[%c2_182, %c0_183, %c0_184] : memref<3x1x32xf32, #tpu.memory_space<vmem>>, vector<1x1x32xf32>
    %329 = vector.shape_cast %328 : vector<1x1x32xf32> to vector<1x32xf32>
    %cst_185 = arith.constant dense<0.000000e+00> : vector<1x32xf32>
    %330 = tpu.matmul %0, %325, %cst_185 {dimension_numbers = #tpu.dot_dimension_numbers<[1], [0], [0], [1], [0, 0, 1, 1], [], []>} : vector<1x16xf32>, vector<16x32xf32>, vector<1x32xf32> -> vector<1x32xf32>
    %331 = arith.mulf %325, %325 : vector<16x32xf32>
    %cst_186 = arith.constant dense<0.000000e+00> : vector<1x32xf32>
    %332 = tpu.matmul %0, %331, %cst_186 {dimension_numbers = #tpu.dot_dimension_numbers<[1], [0], [0], [1], [0, 0, 1, 1], [], []>} : vector<1x16xf32>, vector<16x32xf32>, vector<1x32xf32> -> vector<1x32xf32>
    %333 = vector.shape_cast %330 : vector<1x32xf32> to vector<1x1x32xf32>
    %cst_187 = arith.constant dense<0.000000e+00> : vector<1xf32>
    %334 = vector.multi_reduction <add>, %333, %cst_187 [1, 2] : vector<1x1x32xf32> to vector<1xf32>
    %335 = vector.shape_cast %334 : vector<1xf32> to vector<1x1x1xf32>
    %336 = vector.extract %335[0, 0, 0] : f32 from vector<1x1x1xf32>
    %cst_188 = arith.constant 0.001953125 : f32
    %337 = arith.mulf %336, %cst_188 : f32
    %338 = vector.shape_cast %332 : vector<1x32xf32> to vector<1x1x32xf32>
    %cst_189 = arith.constant dense<0.000000e+00> : vector<1xf32>
    %339 = vector.multi_reduction <add>, %338, %cst_189 [1, 2] : vector<1x1x32xf32> to vector<1xf32>
    %340 = vector.shape_cast %339 : vector<1xf32> to vector<1x1x1xf32>
    %341 = vector.extract %340[0, 0, 0] : f32 from vector<1x1x1xf32>
    %cst_190 = arith.constant 0.001953125 : f32
    %342 = arith.mulf %341, %cst_190 : f32
    %343 = arith.mulf %337, %337 : f32
    %344 = arith.subf %342, %343 : f32
    %cst_191 = arith.constant 0.000000e+00 : f32
    %345 = arith.maximumf %344, %cst_191 : f32
    %cst_192 = arith.constant 9.99999993E-9 : f32
    %346 = arith.addf %345, %cst_192 : f32
    %347 = math.rsqrt %346 : f32
    %348 = vector.broadcast %337 : f32 to vector<16x32xf32>
    %349 = arith.subf %325, %348 : vector<16x32xf32>
    %350 = vector.broadcast %347 : f32 to vector<16x32xf32>
    %351 = arith.mulf %349, %350 : vector<16x32xf32>
    %352 = vector.broadcast %327 : vector<1x32xf32> to vector<16x32xf32>
    %353 = arith.mulf %352, %351 : vector<16x32xf32>
    %354 = vector.broadcast %329 : vector<1x32xf32> to vector<16x32xf32>
    %355 = arith.addf %353, %354 : vector<16x32xf32>
    %356 = arith.truncf %355 : vector<16x32xf32> to vector<16x32xbf16>
    %c2_193 = arith.constant 2 : index
    %c0_194 = arith.constant 0 : index
    %c0_195 = arith.constant 0 : index
    %357 = vector.load %arg17[%c2_193, %c0_194, %c0_195] : memref<3x32x16xbf16, #tpu.memory_space<vmem>>, vector<1x32x16xbf16>
    %358 = vector.shape_cast %357 : vector<1x32x16xbf16> to vector<32x16xbf16>
    %cst_196 = arith.constant dense<0.000000e+00> : vector<16x16xf32>
    %359 = tpu.matmul %356, %358, %cst_196 {dimension_numbers = #tpu.dot_dimension_numbers<[1], [0], [0], [1], [0, 0, 1, 1], [], []>} : vector<16x32xbf16>, vector<32x16xbf16>, vector<16x16xf32> -> vector<16x16xf32>
    %c2_197 = arith.constant 2 : index
    %c0_198 = arith.constant 0 : index
    %c0_199 = arith.constant 0 : index
    %360 = vector.load %arg18[%c2_197, %c0_198, %c0_199] : memref<3x1x16xf32, #tpu.memory_space<vmem>>, vector<1x1x16xf32>
    %361 = vector.shape_cast %360 : vector<1x1x16xf32> to vector<1x16xf32>
    %362 = vector.broadcast %361 : vector<1x16xf32> to vector<16x16xf32>
    %363 = arith.addf %359, %362 : vector<16x16xf32>
    %c0_200 = arith.constant 0 : index
    %c0_201 = arith.constant 0 : index
    %364 = vector.load %arg21[%c0_200, %c0_201] : memref<16x16xf32, #tpu.memory_space<vmem>>, vector<16x16xf32>
    %365 = arith.addf %364, %363 : vector<16x16xf32>
    %c0_202 = arith.constant 0 : index
    %c0_203 = arith.constant 0 : index
    %366 = vector.load %arg21[%c0_202, %c0_203] : memref<16x16xf32, #tpu.memory_space<vmem>>, vector<16x16xf32>
    tpu.vector_store %arg21[%c0_202, %c0_203], %365 {strides = array<i32>} : memref<16x16xf32, #tpu.memory_space<vmem>>, vector<16x16xf32>,
    %c1_i32 = arith.constant 1 : i32
    %367 = arith.cmpi eq, %arg1, %c1_i32 : i32
    %368 = arith.extui %367 : i1 to i32
    %c0_i32_204 = arith.constant 0 : i32
    %369 = arith.cmpi ne, %368, %c0_i32_204 : i32
    scf.if %369 {
      %c0_205 = arith.constant 0 : index
      %c0_206 = arith.constant 0 : index
      %370 = vector.load %arg21[%c0_205, %c0_206] : memref<16x16xf32, #tpu.memory_space<vmem>>, vector<16x16xf32>
      %c0_207 = arith.constant 0 : index
      %c0_208 = arith.constant 0 : index
      %371 = vector.load %arg19[%c0_207, %c0_208] : memref<1x1xf32, #tpu.memory_space<vmem>>, vector<1x1xf32>
      %cst_209 = arith.constant 0.000000e+00 : f32
      %372 = vector.broadcast %cst_209 : f32 to vector<16x16xf32>
      %373 = arith.cmpf oge, %370, %372 : vector<16x16xf32>
      %374 = vector.broadcast %371 : vector<1x1xf32> to vector<16x16xf32>
      %375 = arith.mulf %374, %370 : vector<16x16xf32>
      %376 = arith.select %373, %370, %375 : vector<16x16xi1>, vector<16x16xf32>
      %cst_210 = arith.constant dense<0.000000e+00> : vector<1x16xf32>
      %377 = tpu.matmul %0, %376, %cst_210 {dimension_numbers = #tpu.dot_dimension_numbers<[1], [0], [0], [1], [0, 0, 1, 1], [], []>} : vector<1x16xf32>, vector<16x16xf32>, vector<1x16xf32> -> vector<1x16xf32>
      %cst_211 = arith.constant 6.250000e-02 : f32
      %378 = vector.broadcast %cst_211 : f32 to vector<1x16xf32>
      %379 = arith.mulf %377, %378 : vector<1x16xf32>
      %c0_212 = arith.constant 0 : index
      %c0_213 = arith.constant 0 : index
      %c0_214 = arith.constant 0 : index
      %380 = vector.load %arg20[%c0_212, %c0_213, %c0_214] : memref<1x1x16xf32, #tpu.memory_space<vmem>>, vector<1x1x16xf32>
      %381 = vector.shape_cast %380 : vector<1x1x16xf32> to vector<1x16xf32>
      %382 = vector.shape_cast %379 : vector<1x16xf32> to vector<1x1x16xf32>
      tpu.vector_store %arg20[%c0_212, %c0_213, %c0_214], %382 {strides = array<i32>} : memref<1x1x16xf32, #tpu.memory_space<vmem>>, vector<1x1x16xf32>,
    } else {
    }
    return
  }
  func.func @transform_0(%arg0: i32, %arg1: i32) -> (i32, i32, i32) {
    %c0_i32 = arith.constant 0 : i32
    %c0_i32_0 = arith.constant 0 : i32
    %c0_i32_1 = arith.constant 0 : i32
    return %arg0, %c0_i32, %c0_i32_0 : i32, i32, i32
  }
  func.func @transform_1(%arg0: i32, %arg1: i32) -> (i32, i32) {
    %c0_i32 = arith.constant 0 : i32
    %c0_i32_0 = arith.constant 0 : i32
    %c0_i32_1 = arith.constant 0 : i32
    return %c0_i32, %c0_i32_0 : i32, i32
  }
  func.func @transform_2(%arg0: i32, %arg1: i32) -> (i32, i32) {
    %c0_i32 = arith.constant 0 : i32
    %c0_i32_0 = arith.constant 0 : i32
    %c0_i32_1 = arith.constant 0 : i32
    return %c0_i32, %c0_i32_0 : i32, i32
  }
  func.func @transform_3(%arg0: i32, %arg1: i32) -> (i32, i32) {
    %c0_i32 = arith.constant 0 : i32
    %c0_i32_0 = arith.constant 0 : i32
    %c0_i32_1 = arith.constant 0 : i32
    return %c0_i32, %c0_i32_0 : i32, i32
  }
  func.func @transform_4(%arg0: i32, %arg1: i32) -> (i32, i32) {
    %c0_i32 = arith.constant 0 : i32
    %c0_i32_0 = arith.constant 0 : i32
    %c0_i32_1 = arith.constant 0 : i32
    return %c0_i32, %c0_i32_0 : i32, i32
  }
  func.func @transform_5(%arg0: i32, %arg1: i32) -> (i32, i32, i32) {
    %c0_i32 = arith.constant 0 : i32
    %c0_i32_0 = arith.constant 0 : i32
    %c0_i32_1 = arith.constant 0 : i32
    return %arg1, %c0_i32, %c0_i32_0 : i32, i32, i32
  }
  func.func @transform_6(%arg0: i32, %arg1: i32) -> (i32, i32, i32) {
    %c0_i32 = arith.constant 0 : i32
    %c0_i32_0 = arith.constant 0 : i32
    %c0_i32_1 = arith.constant 0 : i32
    return %arg1, %c0_i32, %c0_i32_0 : i32, i32, i32
  }
  func.func @transform_7(%arg0: i32, %arg1: i32) -> (i32, i32, i32) {
    %c0_i32 = arith.constant 0 : i32
    %c0_i32_0 = arith.constant 0 : i32
    %c0_i32_1 = arith.constant 0 : i32
    return %arg1, %c0_i32, %c0_i32_0 : i32, i32, i32
  }
  func.func @transform_8(%arg0: i32, %arg1: i32) -> (i32, i32, i32) {
    %c0_i32 = arith.constant 0 : i32
    %c0_i32_0 = arith.constant 0 : i32
    %c0_i32_1 = arith.constant 0 : i32
    return %arg1, %c0_i32, %c0_i32_0 : i32, i32, i32
  }
  func.func @transform_9(%arg0: i32, %arg1: i32) -> (i32, i32, i32) {
    %c0_i32 = arith.constant 0 : i32
    %c0_i32_0 = arith.constant 0 : i32
    %c0_i32_1 = arith.constant 0 : i32
    return %arg1, %c0_i32, %c0_i32_0 : i32, i32, i32
  }
  func.func @transform_10(%arg0: i32, %arg1: i32) -> (i32, i32, i32) {
    %c0_i32 = arith.constant 0 : i32
    %c0_i32_0 = arith.constant 0 : i32
    %c0_i32_1 = arith.constant 0 : i32
    return %arg1, %c0_i32, %c0_i32_0 : i32, i32, i32
  }
  func.func @transform_11(%arg0: i32, %arg1: i32) -> (i32, i32, i32) {
    %c0_i32 = arith.constant 0 : i32
    %c0_i32_0 = arith.constant 0 : i32
    %c0_i32_1 = arith.constant 0 : i32
    return %arg1, %c0_i32, %c0_i32_0 : i32, i32, i32
  }
  func.func @transform_12(%arg0: i32, %arg1: i32) -> (i32, i32, i32) {
    %c0_i32 = arith.constant 0 : i32
    %c0_i32_0 = arith.constant 0 : i32
    %c0_i32_1 = arith.constant 0 : i32
    return %arg1, %c0_i32, %c0_i32_0 : i32, i32, i32
  }
  func.func @transform_13(%arg0: i32, %arg1: i32) -> (i32, i32, i32) {
    %c0_i32 = arith.constant 0 : i32
    %c0_i32_0 = arith.constant 0 : i32
    %c0_i32_1 = arith.constant 0 : i32
    return %arg1, %c0_i32, %c0_i32_0 : i32, i32, i32
  }
  func.func @transform_14(%arg0: i32, %arg1: i32) -> (i32, i32, i32) {
    %c0_i32 = arith.constant 0 : i32
    %c0_i32_0 = arith.constant 0 : i32
    %c0_i32_1 = arith.constant 0 : i32
    return %arg1, %c0_i32, %c0_i32_0 : i32, i32, i32
  }
  func.func @transform_15(%arg0: i32, %arg1: i32) -> (i32, i32, i32) {
    %c0_i32 = arith.constant 0 : i32
    %c0_i32_0 = arith.constant 0 : i32
    %c0_i32_1 = arith.constant 0 : i32
    return %arg1, %c0_i32, %c0_i32_0 : i32, i32, i32
  }
  func.func @transform_16(%arg0: i32, %arg1: i32) -> (i32, i32, i32) {
    %c0_i32 = arith.constant 0 : i32
    %c0_i32_0 = arith.constant 0 : i32
    %c0_i32_1 = arith.constant 0 : i32
    return %arg1, %c0_i32, %c0_i32_0 : i32, i32, i32
  }
  func.func @transform_17(%arg0: i32, %arg1: i32) -> (i32, i32) {
    %c0_i32 = arith.constant 0 : i32
    %c0_i32_0 = arith.constant 0 : i32
    %c0_i32_1 = arith.constant 0 : i32
    return %c0_i32, %c0_i32_0 : i32, i32
  }
  func.func @transform_18(%arg0: i32, %arg1: i32) -> (i32, i32, i32) {
    %c0_i32 = arith.constant 0 : i32
    %c0_i32_0 = arith.constant 0 : i32
    %c0_i32_1 = arith.constant 0 : i32
    return %arg0, %c0_i32, %c0_i32_0 : i32, i32, i32
  }
}

</mosaic_0001>

<bundles_post_ra>
// kernel: tpu_custom_call.1
= control target key start
LH: loop header
LB: loop body
LE: loop exit
PB: predicated region body
PF: predicated region fallthrough
CT: control target
= control target key end

     0   :  { %s3350_s0 = inlined_call_operand.vmem [shape: f32[2,16,8], index: 0, kind: input, shape index: {}]   ;;  %s3351_s1 = inlined_call_operand.vmem [shape: f32[1,8], index: 1, kind: input, shape index: {}]   ;;  %s3352_s2 = inlined_call_operand.vmem [shape: f32[1,8], index: 2, kind: input, shape index: {}]   ;;  %s3353_s3 = inlined_call_operand.vmem [shape: bf16[8,16], index: 3, kind: input, shape index: {}]   ;;  %s3354_s4 = inlined_call_operand.vmem [shape: f32[1,16], index: 4, kind: input, shape index: {}]   ;;  %s3355_s5 = inlined_call_operand.vmem [shape: bf16[6,16,32], index: 5, kind: input, shape index: {}]   ;;  %s3356_s6 = inlined_call_operand.vmem [shape: f32[6,1,32], index: 6, kind: input, shape index: {}]   ;;  %s3357_s7 = inlined_call_operand.vmem [shape: f32[6,1,1], index: 7, kind: input, shape index: {}]   ;;  %s3358_s8 = inlined_call_operand.vmem [shape: f32[6,1,32], index: 8, kind: input, shape index: {}]   ;;  %s3359_s9 = inlined_call_operand.vmem [shape: f32[6,1,32], index: 9, kind: input, shape index: {}]   ;;  %s3360_s10 = inlined_call_operand.vmem [shape: f32[6,3,32], index: 10, kind: input, shape index: {}]   ;;  %s3361_s11 = inlined_call_operand.vmem [shape: f32[6,1,32], index: 11, kind: input, shape index: {}]   ;;  %s3362_s12 = inlined_call_operand.vmem [shape: f32[6,1,1], index: 12, kind: input, shape index: {}]   ;;  %s3363_s13 = inlined_call_operand.vmem [shape: f32[6,1,32], index: 13, kind: input, shape index: {}]   ;;  %s3364_s14 = inlined_call_operand.vmem [shape: f32[6,1,32], index: 14, kind: input, shape index: {}]   ;;  %s3365_s15 = inlined_call_operand.vmem [shape: bf16[6,32,16], index: 15, kind: input, shape index: {}]   ;;  %s3366_s16 = inlined_call_operand.vmem [shape: f32[6,1,16], index: 16, kind: input, shape index: {}]   ;;  %s3367_s17 = inlined_call_operand.<no memory space> [shape: f32[1,1], index: 17, kind: input, shape index: {}]   ;;  %s3368_s18 = inlined_call_operand.hbm [shape: f32[2,1,16], index: 18, kind: output, shape index: {}]  }
   0x1   :  { %3381 = sst [smem:[#allocation19_spill]] %s3350_s0  ;;  %v23_v0 = vstv %s3367_s17 }
   0x2   :  { %3382 = sst [smem:[#allocation20_spill]] %s3351_s1  ;;  %24 = vst [vmem:[#allocation4] sm:$0x1] %v23_v0 }
   0x3   :  { %3383 = sst [smem:[#allocation21_spill]] %s3352_s2 }
   0x4   :  { %3384 = sst [smem:[#allocation22_spill]] %s3353_s3 }
   0x5   :  { %3385 = sst [smem:[#allocation23_spill]] %s3354_s4 }
   0x6   :  { %3386 = sst [smem:[#allocation24_spill]] %s3355_s5 }
   0x7   :  { %3387 = sst [smem:[#allocation25_spill]] %s3356_s6 }
   0x8   :  { %3388 = sst [smem:[#allocation26_spill]] %s3357_s7 }
   0x9   :  { %3389 = sst [smem:[#allocation27_spill]] %s3358_s8 }
   0xa   :  { %3390 = sst [smem:[#allocation28_spill]] %s3359_s9 }
   0xb   :  { %3391 = sst [smem:[#allocation29_spill]] %s3360_s10 }
   0xc   :  { %3392 = sst [smem:[#allocation30_spill]] %s3361_s11 }
   0xd   :  { %3393 = sst [smem:[#allocation31_spill]] %s3368_s18 }
   0xe   :  { %25 = vsyncpa [#allocation6], 0 }
   0xf   :  { %27 = vsyncpa [#allocation6 + $0x1], 0  ;;  %s2931_s29 = smov 0   ;;  %s2933_s30 = smov 0  }
  0x10   :  { %s2935_s0 = smov 0   ;;  %s2937_s19 = smov 0  }
  0x11   :  { %s2939_s1 = smov 0   ;;  %s2941_s20 = smov 0  }
  0x12   :  { %s2943_s21 = smov 0   ;;  %s2945_s22 = smov 0  }
  0x13 LB: > { %3394 = sst [smem:[#allocation8_spill]] %s2795_s29  ;;  %s2436_s17 = sadd.s32 4294967295, %s2823_s22   ;;  %s2823_s22 = sphi %s2945_s22, %s33_s22   ;;  %s2819_s21 = sphi %s2943_s21, %s3432_s21   ;;  %s2815_s20 = sphi %s2941_s20, %s3431_s20   ;;  %s2811_s1 = sphi %s2939_s1, %s3430_s1   ;;  %s2807_s19 = sphi %s2937_s19, %s3429_s19   ;;  %s2803_s0 = sphi %s2935_s0, %s3428_s0   ;;  %s2799_s30 = sphi %s2933_s30, %s3434_s30   ;;  %s2795_s29 = sphi %s2931_s29, %s3433_s29  }
  0x14   : > { %3395 = sst [smem:[#allocation9_spill]] %s2803_s0  ;;  %s2437_s2 = sadd.s32 4294967294, %s2823_s22  }
  0x15   : > { %3396 = sst [smem:[#allocation10_spill]] %s2811_s1  ;;  %s42_s23 = sadd.s32 1, %s2815_s20 }
  0x16   : > { %3397 = sst [smem:[#allocation11_spill]] %s2815_s20  ;;  %p43_p0 = scmp.ge.s32.totalorder %s42_s23, 2 }
  0x17   : > { %3398 = sst [smem:[#allocation12_spill]] %s2819_s21  ;;  %s45_s24 = sadd.s32 1, %s2819_s21 }
  0x18   : > { %3399 = sst [smem:[#allocation13_spill]] %s2823_s22  ;;  %p505_p1 = scmp.ne.s32.totalorder %s2803_s0, %s2799_s30 }
  0x19   : > { %p506_p2 = scmp.eq.s32.totalorder %s2436_s17, 3  ;;  %s3436_s23 = smov (%p43_p0, %s42_s23), 0 }
  0x1a   : > { %3400 = sst [smem:[#allocation14_spill]] %s3436_s23  ;;  %s3438_s24 = smov (!%p43_p0, %s45_s24), %s2819_s21 }
  0x1b   : > { %p2980_p3 = por %p506_p2, %p505_p1  ;;  %p511_p4 = scmp.ne.s32.totalorder %s2799_s30, %s2795_s29 }
  0x1c   : > { %p47_p5 = scmp.ge.s32.totalorder %s3438_s24, 2  ;;  %p512_p6 = scmp.eq.s32.totalorder %s2437_s2, 3 }
  0x1d   : > { %s3401_s25 = scalar_select %p2980_p3, 1, 0 }
  0x1e   : > { %p2440_p7 = scmp.ge.s32.totalorder %s2823_s22, 1  ;;  %p654_p8 = scmp.lt.s32.totalorder %s2823_s22, 5 }
  0x1f   : > { %3402 = sst [smem:[#allocation15_spill]] %s3401_s25  ;;  %s3440_s24 = smov (%p47_p5, %s3438_s24), 0 }
  0x20   : > { %3403 = sst [smem:[#allocation16_spill]] %s3440_s24  ;;  %p2990_p9 = por %p512_p6, %p511_p4 }
  0x21   : > { %p655_p10 = pnand %p2440_p7, %p654_p8  ;;  %s492_s27 = ssub.s32 %s2819_s21, %s3440_s24 }
  0x22   : > { %s3404_s26 = scalar_select %p2990_p9, 1, 0 }
  0x23   : > { %s495_s28 = sadd.s32 1, %s2803_s0  ;;  %p493_p11 = scmp.eq.s32.totalorder %s492_s27, 0 }
  0x24   : > { %3405 = sst [smem:[#allocation17_spill]] %s3404_s26  ;;  %658 = sbr.rel (%p655_p10) target bundleno = 4261 (0x10a5), region = 92 }
  0x25   : > { %s2998_s17 = scalar_select %p493_p11, %s2803_s0, %s495_s28  }
  0x26   : > { %p760_p12 = scmp.lt.s32.totalorder (!%p655_p10), %s2811_s1, 1  ;;  %s765_s23 = smul.u32 (!%p655_p10), 3, %s2807_s19 }
  0x27   : > { %3406 = sst [smem:[#allocation18_spill]] %s2998_s17  ;;  %p2448_p0 = scmp.ne.s32.totalorder (!%p655_p10), %s2807_s19, 0 }
  0x28   : > { %p766_p13 = scmp.lt.s32.totalorder (!%p655_p10), %s765_s23, 5  ;;  %s3407_s26 = sld [smem:[#allocation19_spill]] (!%p655_p10) }
  0x29   : > { %s761_s20 = scalar_select %p760_p12, %s2811_s1, 1 }
  0x2a   : > { %s3442_s23 = smov (!%p766_p13, %s765_s23), 5  ;;  %s3408_s6 = sld [smem:[#allocation25_spill]] }
  0x2b   : > { %s2542_s29 = sshll.u32 %s761_s20, 4  ;;  %s2543_s27 = sshll.u32 %s3442_s23, 3 }
  0x2c   : > { %s3409_s5 = sld [smem:[#allocation24_spill]]  ;;  %s2445_s28 = sshll.u32 %s3442_s23, 2 }
  0x2d   : > { %s3410_s7 = sld [smem:[#allocation26_spill]]  ;;  %s2544_s0 = sshll.u32 %s3442_s23, 4 }
  0x2e   : > { %s764_s18 = scalar_lea.vmem %s3407_s26, %s2542_s29  ;;  %s3411_s8 = sld [smem:[#allocation27_spill]] }
  0x2f   : > { %s3412_s9 = sld [smem:[#allocation28_spill]]  ;;  %s3045_s29 = scalar_lea.vmem %s3362_s12, %s3442_s23 }
  0x30   : > { %s3010_s21 = scalar_lea.vmem %s3408_s6, %s3442_s23  ;;  %s3413_s11 = sld [smem:[#allocation30_spill]] }
  0x31   : > { %s3414_s10 = sld [smem:[#allocation29_spill]]  ;;  %s3050_s26 = scalar_lea.vmem %s3363_s13, %s3442_s23 }
  0x32   : > { %s3015_s2 = scalar_lea.vmem %s3409_s5, %s2543_s27  ;;  %s3055_s6 = scalar_lea.vmem %s3364_s14, %s3442_s23 }
  0x33   : > { %s3020_s20 = scalar_lea.vmem %s3410_s7, %s3442_s23  ;;  %s3065_s22 = scalar_lea.vmem %s3365_s15, %s2544_s0 }
  0x34   : > { %s3025_s25 = scalar_lea.vmem %s3411_s8, %s3442_s23  ;;  %s2827_s3 = smov (!%p2448_p0), 0.0  }
  0x35   : > { %s3030_s24 = scalar_lea.vmem %s3412_s9, %s3442_s23  ;;  %834 = sbr.rel (%p2448_p0) target bundleno = 603 (0x25b), region = 96 }
  0x36   : > { %s3035_s17 = scalar_lea.vmem %s3413_s11, %s3442_s23  ;;  %s3419_s5 = sld [smem:[#allocation23_spill]] (!%p2448_p0) }
  0x37   : > { %s3040_s1 = scalar_lea.vmem %s3414_s10, %s2445_s28  ;;  %s3060_s28 = scalar_lea.vmem %s3366_s16, %s3442_s23 }
  0x38   : > { %s3415_s10 = sand.u32 1, %s2799_s30  }
  0x39   : > { %s3069_s7 = scalar_lea.vmem [#allocation5], %s3415_s10 }
  0x3a   : > { %vm835_vm0 = vcmask 257024   ;;  %vm840_vm1 = vcmask 254976   ;;  %v3072_v1 = vld [vmem:[%s764_s18 + $0x8] sm:$0xff]  ;;  %v3074_v2 = vld [vmem:[%s764_s18] sm:$0xff]  ;;  %vm846_vm2 = vcmask 130048   ;;  %v2825_v5 = vmov 0  }
  0x3b   : > { %864 = vmatpush.msra.mxu0 %v3072_v1  ;;  %v871_v3 = vmul.f32 %v3072_v1, %v3072_v1  ;;  %v870_v4 = vmul.f32 %v3074_v2, %v3074_v2  ;;  %837 = vst.msk [vmem:[#allocation3 + $0x4] sm:$0xf] %vm835_vm0, %v2825_v5  ;;  %v2826_v6 = vmov 1.0   ;;  %vm892_vm3 = vcmask 57344  }
  0x3c   : > { %838 = vst.msk [vmem:[#allocation3 + $0x8] sm:$0xf] %vm835_vm0, %v2825_v5  ;;  %vm957_vm7 = vcmask 1043456   ;;  %vm953_vm8 = vcmask 64512   ;;  %v2682_v48 = vld [vmem:[%s3419_s5] ss:$0 sm:$0xff] }
  0x3d   : > { %865 = vmatpush.msra.mxu0 %v3074_v2  ;;  %886 = vmatpush.msra.mxu1 %v871_v3  ;;  %839 = vst.msk [vmem:[#allocation3 + $0xc] sm:$0xf] %vm835_vm0, %v2825_v5 }
  0x3e   : > { %2449 = vmatmul.msk.f32.vlgmr.msra.gmra.mxu0 %vm846_vm2, %v2826_v6  ;;  %841 = vst.msk [vmem:[#allocation3 + $0x10] sm:$0x3] %vm840_vm1, %v2825_v5 }
  0x3f   : > { %887 = vmatpush.msra.mxu1 %v870_v4 }
  0x40   : > { %2450 = vmatmul.msk.f32.vlgmr.msra.gmra.mxu1 %vm846_vm2, %v2826_v6 }
  0xbb   : > { %v867_v7 = vpop.f32.mrf.mxu0 }
  0xbc   : > { %v893_v8 = vsel %vm892_vm3, %v867_v7, 0.0 }
  0xbd   : > { %894 = vadd.xlane.f32.xlu0 %v893_v8  ;;  %v889_v9 = vpop.f32.mrf.mxu1 }
  0xbe   : > { %v904_v10 = vsel %vm892_vm3, %v889_v9, 0.0 }
  0xc5   : > { %905 = vadd.xlane.f32.xlu0 %v904_v10 }
 0x130   : > { %v895_v11 = vpop.xlane.xlu0 %894 }
 0x131   : > { %v896_v12 = vrot.slane %v895_v11, 4 }
 0x133   : > { %v897_v13 = vadd.f32 %v896_v12, %v895_v11 }
 0x135   : > { %v898_v14 = vrot.slane %v897_v13, 2 }
 0x137   : > { %v899_v15 = vadd.f32 %v898_v14, %v897_v13 }
 0x138   : > { %v906_v16 = vpop.xlane.xlu0 %905 }
 0x139   : > { %v907_v17 = vrot.slane %v906_v16, 4  ;;  %v900_v18 = vrot.slane %v899_v15, 1 }
 0x13b   : > { %v908_v19 = vadd.f32 %v907_v17, %v906_v16  ;;  %v901_v20 = vadd.f32 %v900_v18, %v899_v15 }
 0x13d   : > { %v909_v21 = vrot.slane %v908_v19, 2  ;;  %2559 = vpush %v901_v20 }
 0x13f   : > { %v910_v22 = vadd.f32 %v909_v21, %v908_v19 }
 0x141   : > { %v911_v23 = vrot.slane %v910_v22, 1 }
 0x143   : > { %v912_v24 = vadd.f32 %v911_v23, %v910_v22 }
 0x145   : > { %2561 = vpush %v912_v24 }
 0x16e   : > { %s2560_s8 = spop %2559 }
 0x16f   : > { %s903_s9 = smul.f32 0.0078125, %s2560_s8  ;;  %s3416_s8 = sld [smem:[#allocation22_spill]] }
 0x171   : > { %s915_s10 = smul.f32 %s903_s9, %s903_s9  ;;  %v931_v35 = vstv %s903_s9 }
 0x172   : > { %v932_v36 = vsub.f32 %v3074_v2, %v931_v35  ;;  %v933_v37 = vsub.f32 %v3072_v1, %v931_v35 }
 0x175   : > { %v948_v33 = vld [vmem:[%s3416_s8] sm:$0xf] }
 0x176   : > { %s2562_s11 = spop %2561  ;;  %v959_v34 = vsel %vm957_vm7, %v948_v33, 0 }
 0x177   : > { %s914_s18 = smul.f32 0.0078125, %s2562_s11  ;;  %968 = vmatpush.bf16.msra.mxu2 %v959_v34 }
 0x179   : > { %s916_s23 = ssub.f32 %s914_s18, %s915_s10 }
 0x17b   : > { %s917_s0 = smax.f32 %s2827_s3, %s916_s23  ;;  %s3417_s23 = sld [smem:[#allocation20_spill]] }
 0x17c   : > { %s918_s27 = sadd.f32 1e-08, %s917_s0 }
 0x17e   : > { %v919_v25 = vstv %s918_s27  ;;  %s3418_s27 = sld [smem:[#allocation21_spill]] }
 0x17f   : > { %2683 = vrsqrt.f32 %v919_v25  ;;  %vm926_vm5 = vweird.f32 %v919_v25 }
 0x181   : > { %v2680_v38 = vld [vmem:[%s3417_s23] ss:$0 sm:$0xff] }
 0x184   : > { %v2681_v42 = vld [vmem:[%s3418_s27] ss:$0 sm:$0xff] }
 0x185   : > { %v2684_v26 = vpop.eup %2683 }
 0x186   : > { %v921_v27 = vmul.f32 %v2684_v26, %v919_v25  ;;  %vm927_vm4 = vweird.f32 %v2684_v26 }
 0x187   : > { %vm928_vm6 = vmor %vm926_vm5, %vm927_vm4 }
 0x188   : > { %v922_v28 = vmul.f32 %v2684_v26, %v921_v27 }
 0x18a   : > { %v923_v29 = vmul.f32 0.5, %v922_v28 }
 0x18c   : > { %v924_v30 = vsub.f32 1.5, %v923_v29 }
 0x18e   : > { %v925_v31 = vmul.f32 %v2684_v26, %v924_v30 }
 0x190   : > { %v929_v32 = vsel %vm928_vm6, %v2684_v26, %v925_v31 }
 0x191   : > { %2563 = vpush %v929_v32 }
 0x1c2   : > { %s2564_s10 = spop %2563 }
 0x1c3   : > { %v934_v39 = vstv %s2564_s10 }
 0x1c4   : > { %v935_v40 = vmul.f32 %v934_v39, %v932_v36  ;;  %v936_v41 = vmul.f32 %v934_v39, %v933_v37 }
 0x1c6   : > { %v940_v43 = vmul.f32 %v2680_v38, %v935_v40  ;;  %v941_v44 = vmul.f32 %v2680_v38, %v936_v41 }
 0x1c8   : > { %v945_v45 = vadd.f32 %v2681_v42, %v940_v43  ;;  %v946_v46 = vadd.f32 %v2681_v42, %v941_v44 }
 0x1ca   : > { %v947_v47 = vpack.c.bf16 %v946_v46, %v945_v45 }
 0x1cc   : > { %2451 = vmatmul.msk.bf16.vlgmr.msra.gmra.mxu2 %vm953_vm8, %v947_v47 }
 0x24f   : > { %v970_v49 = vpop.f32.mrf.mxu2 }
 0x250   : > { %v971_v50 = vadd.f32 %v2682_v48, %v970_v49 }
 0x252   : > { %975 = vst.msk [vmem:[#allocation2] sm:$0xff] %vm846_vm2, %v971_v50 }
 0x257   : > { %v972_v51 = vpop.f32.mrf.mxu2 }
 0x258   : > { %v973_v52 = vadd.f32 %v2682_v48, %v972_v51 }
 0x25a   : > { %976 = vst.msk [vmem:[#allocation2 + $0x8] sm:$0xff] %vm846_vm2, %v973_v52 }
 0x25b PF: > { %v2545_v53 = vld [vmem:[%s3015_s2] sm:$0xff]  ;;  %v2828_v57 = vmov 0   ;;  %vm992_vm9 = vcmask 130048   ;;  %v2829_v7 = vmov 1.0   ;;  %vm1070_vm12 = vcmask 253952   ;;  %s2830_s0 = smov 0.0  }
 0x25c   : > { %v3101_v54 = vld [vmem:[#allocation2] sm:$0xff]  ;;  %2685 = vset.pattern.permute.xlu0 %v2828_v57  ;;  %2686 = vset.pattern.permute.xlu1 %v2828_v57  ;;  %vm1127_vm0 = vcmask 257024   ;;  %v1131_v52 = vld [vmem:[#allocation3 + $0x4] sm:$0x8]  ;;  %vm1149_vm1 = vcmask 1046528   ;;  %vm1168_vm2 = vcmask 1045504  }
 0x25d   : > { %v2688_v58 = vld [vmem:[%s3020_s20] ss:$0 sm:$0xff]  ;;  %1003 = vmatpush.bf16.msra.mxu0 %v2545_v53  ;;  %2687 = vset.pattern.permute.xlu2 %v2828_v57  ;;  %v2690_v12 = vld [vmem:[%s3045_s29 + $0x1] ss:$0 sm:$0xff]  ;;  %v1134_v57 = vunpack.c.l.bf16 %v1131_v52  ;;  %vm1208_vm6 = vcmask 1040384   ;;  %p2538_p1 = scmp.ne.s32.totalorder %s2807_s19, 1 }
 0x25e   : > { %1016 = vperm.xlu0 %2685, %v2688_v58   ;;  %v2689_v60 = vld [vmem:[%s3010_s21] ss:$0 sm:$0xff] }
 0x25f   : > { %v2691_v13 = vld [vmem:[%s3045_s29] ss:$0 sm:$0xff] }
 0x260   : > { %v2692_v39 = vld [vmem:[%s3025_s25] ss:$0 sm:$0xff] }
 0x261   : > { %v3103_v55 = vld [vmem:[#allocation2 + $0x8] sm:$0xff]  ;;  %v2693_v43 = vld [vmem:[%s3030_s24] ss:$0 sm:$0xff] }
 0x262   : > { %v979_v56 = vpack.c.bf16 %v3103_v55, %v3101_v54  ;;  %v1130_v50 = vld [vmem:[%s3040_s1] sm:$0x7] }
 0x263   : > { %v1159_v51 = vld [vmem:[#allocation3 + $0x10] sm:$0x1]  ;;  %v1144_v58 = vperm.slane %v1130_v50, 1 }
 0x264   : > { %2456 = vmatmul.msk.bf16.vlgmr.msra.gmra.mxu0 %vm992_vm9, %v979_v56  ;;  %v1160_v53 = vunpack.c.l.bf16 %v1159_v51  ;;  %v1161_v56 = vperm.slane %v1130_v50, 2 }
 0x2d0   : > { %v1017_v62 = vpop.permute.xlu0 %1016 }
 0x2e1   : > { %v1005_v59 = vpop.f32.mrf.mxu0 }
 0x2e2   : > { %v1006_v61 = vadd.f32 %v2689_v60, %v1005_v59  ;;  %v1164_v59 = vmul.f32 %v1161_v56, %v1160_v53 }
 0x2e4   : > { %v1019_v0 = vmul.f32 %v1017_v62, %v1006_v61  ;;  %vm1011_vm10 = vcmp.ge.f32.partialorder %v1006_v61, 0.0 }
 0x2e6   : > { %v1021_v4 = vsel %vm1011_vm10, %v1006_v61, %v1019_v0  ;;  %v1137_v61 = vperm.slane %v1130_v50, 0 }
 0x2e7   : > { %v1048_v6 = vmul.f32 %v1021_v4, %v1021_v4 }
 0x2e8   : > { %v1138_v0 = vmul.f32 %v1137_v61, %v1134_v57 }
 0x2e9   : > { %v1007_v63 = vpop.f32.mrf.mxu0 }
 0x2ea   : > { %v1008_v1 = vadd.f32 %v2689_v60, %v1007_v63 }
 0x2ec   : > { %v1020_v2 = vmul.f32 %v1017_v62, %v1008_v1  ;;  %vm1012_vm11 = vcmp.ge.f32.partialorder %v1008_v1, 0.0 }
 0x2ee   : > { %v3110_v3 = vsel %vm1012_vm11, %v1008_v1, %v1020_v2  ;;  %vm1337_vm11 = vsmask.f32 4352 }
 0x2ef   : > { %1042 = vmatpush.msra.mxu1 %v3110_v3  ;;  %v1049_v5 = vmul.f32 %v3110_v3, %v3110_v3 }
 0x2f1   : > { %1043 = vmatpush.msra.mxu1 %v1021_v4  ;;  %1064 = vmatpush.msra.mxu3 %v1049_v5 }
 0x2f2   : > { %2457 = vmatmul.msk.f32.vlgmr.msra.gmra.mxu1 %vm992_vm9, %v2829_v7 }
 0x2f3   : > { %1065 = vmatpush.msra.mxu3 %v1048_v6 }
 0x2f4   : > { %2458 = vmatmul.msk.f32.vlgmr.msra.gmra.mxu3 %vm992_vm9, %v2829_v7 }
 0x36f   : > { %v1045_v8 = vpop.f32.mrf.mxu1 }
 0x370   : > { %v1071_v9 = vsel %vm1070_vm12, %v1045_v8, 0.0 }
 0x371   : > { %1072 = vadd.xlane.f32.xlu0 %v1071_v9 }
 0x377   : > { %v1067_v10 = vpop.f32.mrf.mxu3 }
 0x378   : > { %v1082_v11 = vsel %vm1070_vm12, %v1067_v10, 0.0 }
 0x379   : > { %1083 = vadd.xlane.f32.xlu1 %v1082_v11 }
 0x385   : > { %1613 = vperm.xlu0 %2685, %v2690_v12  }
 0x392   : > { %1194 = vperm.xlu1 %2686, %v2691_v13   ;;  %v2694_v13 = vld [vmem:[%s3035_s17] ss:$0 sm:$0xff] }
 0x3e4   : > { %v1073_v14 = vpop.xlane.xlu0 %1072 }
 0x3e5   : > { %v1074_v15 = vrot.slane %v1073_v14, 4 }
 0x3e7   : > { %v1075_v16 = vadd.f32 %v1074_v15, %v1073_v14 }
 0x3e9   : > { %v1076_v17 = vrot.slane %v1075_v16, 2 }
 0x3eb   : > { %v1077_v18 = vadd.f32 %v1076_v17, %v1075_v16 }
 0x3ec   : > { %v1084_v19 = vpop.xlane.xlu1 %1083 }
 0x3ed   : > { %v1085_v20 = vrot.slane %v1084_v19, 4  ;;  %v1078_v21 = vrot.slane %v1077_v18, 1 }
 0x3ef   : > { %v1086_v22 = vadd.f32 %v1085_v20, %v1084_v19  ;;  %v1079_v23 = vadd.f32 %v1078_v21, %v1077_v18 }
 0x3f1   : > { %v1087_v24 = vrot.slane %v1086_v22, 2  ;;  %2565 = vpush %v1079_v23 }
 0x3f3   : > { %v1088_v25 = vadd.f32 %v1087_v24, %v1086_v22 }
 0x3f5   : > { %v1089_v26 = vrot.slane %v1088_v25, 1 }
 0x3f7   : > { %v1090_v27 = vadd.f32 %v1089_v26, %v1088_v25 }
 0x3f9   : > { %2567 = vpush %v1090_v27 }
 0x404   : > { %v1195_v22 = vpop.permute.xlu1 %1194 }
 0x422   : > { %s2566_s8 = spop %2565 }
 0x423   : > { %s1081_s10 = smul.f32 0.001953125, %s2566_s8 }
 0x425   : > { %s1093_s11 = smul.f32 %s1081_s10, %s1081_s10  ;;  %v1109_v36 = vstv %s1081_s10 }
 0x426   : > { %v1110_v37 = vsub.f32 %v1021_v4, %v1109_v36  ;;  %v1111_v38 = vsub.f32 %v3110_v3, %v1109_v36  ;;  %v1172_v3 = vrot.slane %v1164_v59, 2 }
 0x42a   : > { %s2568_s18 = spop %2567 }
 0x42b   : > { %s1092_s23 = smul.f32 0.001953125, %s2568_s18 }
 0x42d   : > { %s1094_s3 = ssub.f32 %s1092_s23, %s1093_s11 }
 0x42f   : > { %s1095_s27 = smax.f32 %s2830_s0, %s1094_s3 }
 0x430   : > { %s1096_s9 = sadd.f32 1e-08, %s1095_s27 }
 0x432   : > { %v1097_v28 = vstv %s1096_s9 }
 0x433   : > { %2715 = vrsqrt.f32 %v1097_v28  ;;  %vm1104_vm14 = vweird.f32 %v1097_v28 }
 0x439   : > { %v2716_v29 = vpop.eup %2715 }
 0x43a   : > { %v1099_v30 = vmul.f32 %v2716_v29, %v1097_v28  ;;  %vm1105_vm13 = vweird.f32 %v2716_v29 }
 0x43b   : > { %vm1106_vm15 = vmor %vm1104_vm14, %vm1105_vm13  ;;  %vm1367_vm13 = vcmask 261120  }
 0x43c   : > { %v1100_v31 = vmul.f32 %v2716_v29, %v1099_v30 }
 0x43e   : > { %v1101_v32 = vmul.f32 0.5, %v1100_v31 }
 0x440   : > { %v1102_v33 = vsub.f32 1.5, %v1101_v32 }
 0x442   : > { %v1103_v34 = vmul.f32 %v2716_v29, %v1102_v33 }
 0x444   : > { %v1107_v35 = vsel %vm1106_vm15, %v2716_v29, %v1103_v34 }
 0x445   : > { %2569 = vpush %v1107_v35 }
 0x476   : > { %s2570_s4 = spop %2569 }
 0x477   : > { %v1112_v40 = vstv %s2570_s4 }
 0x478   : > { %v1113_v41 = vmul.f32 %v1112_v40, %v1110_v37  ;;  %v1114_v42 = vmul.f32 %v1112_v40, %v1111_v38 }
 0x47a   : > { %v1118_v44 = vmul.f32 %v2692_v39, %v1113_v41  ;;  %v1119_v45 = vmul.f32 %v2692_v39, %v1114_v42 }
 0x47c   : > { %v1123_v46 = vadd.f32 %v2693_v43, %v1118_v44  ;;  %v1124_v47 = vadd.f32 %v2693_v43, %v1119_v45 }
 0x47e   : > { %v1125_v48 = vpack.c.bf16 %v1123_v46, %v1123_v46  ;;  %v1126_v49 = vpack.c.bf16 %v1124_v47, %v1124_v47 }
 0x480   : > { %1128 = vst.msk [vmem:[#allocation3 + $0x8] sm:$0xf] %vm1127_vm0, %v1125_v48 }
 0x481   : > { %1129 = vst.msk [vmem:[#allocation3 + $0xc] sm:$0xf] %vm1127_vm0, %v1126_v49 }
 0x488   : > { %v2558_v60 = vld [vmem:[#allocation3 + $0x8] sm:$0xff]  }
 0x489   : > { %v2556_v62 = vunpack.c.l.bf16 %v2558_v60  ;;  %v2557_v63 = vunpack.c.h.bf16 %v2558_v60 }
 0x48b   : > { %v1145_v1 = vmul.f32 %v2556_v62, %v1144_v58  ;;  %v1146_v2 = vmul.f32 %v2557_v63, %v1144_v58  ;;  %v1162_v4 = vmul.f32 %v2556_v62, %v1161_v56  ;;  %v1163_v5 = vmul.f32 %v2557_v63, %v1161_v56 }
 0x48c   : > { %v1140_v6 = vmul.f32 %v2557_v63, %v1137_v61  ;;  %v1139_v10 = vmul.f32 %v2556_v62, %v1137_v61 }
 0x48d   : > { %v1150_v8 = vrot.slane %v1145_v1, 1  ;;  %v1151_v9 = vrot.slane %v1146_v2, 1  ;;  %v1169_v11 = vrot.slane %v1162_v4, 2  ;;  %v1170_v12 = vrot.slane %v1163_v5, 2 }
 0x48f   : > { %v1152_v14 = vsel %vm1149_vm1, %v1150_v8, %v1151_v9  ;;  %v1156_v15 = vadd.f32 %v1150_v8, %v1138_v0  ;;  %v1158_v16 = vadd.f32 %v1151_v9, %v1140_v6  ;;  %v1173_v18 = vsel %vm1168_vm2, %v1170_v12, %v1172_v3 }
 0x490   : > { %v1157_v17 = vadd.f32 %v1152_v14, %v1139_v10  ;;  %v1171_v19 = vsel %vm1168_vm2, %v1169_v11, %v1170_v12  ;;  %v2546_v12 = vld [vmem:[%s3065_s22] sm:$0xff] }
 0x491   : > { %v1177_v20 = vadd.f32 %v1169_v11, %v1156_v15  ;;  %v1179_v21 = vadd.f32 %v1173_v18, %v1158_v16  ;;  %v2547_v11 = vld [vmem:[%s3065_s22 + $0x8] sm:$0xff] }
 0x492   : > { %v1178_v23 = vadd.f32 %v1171_v19, %v1157_v17  ;;  %1377 = vmatpush.bf16.msra.mxu2 %v2547_v11  ;;  %v2695_v17 = vld [vmem:[%s3050_s26] ss:$0 sm:$0xff] }
 0x493   : > { %v1184_v24 = vadd.f32 %v2694_v13, %v1177_v20  ;;  %v1186_v25 = vadd.f32 %v2694_v13, %v1179_v21 }
 0x494   : > { %v1185_v26 = vadd.f32 %v2694_v13, %v1178_v23 }
 0x495   : > { %v1197_v27 = vmul.f32 %v1195_v22, %v1184_v24  ;;  %v1199_v28 = vmul.f32 %v1195_v22, %v1186_v25  ;;  %vm1190_vm3 = vcmp.ge.f32.partialorder %v1186_v25, 0.0  ;;  %vm1188_vm4 = vcmp.ge.f32.partialorder %v1184_v24, 0.0 }
 0x496   : > { %v1198_v29 = vmul.f32 %v1195_v22, %v1185_v26  ;;  %vm1189_vm5 = vcmp.ge.f32.partialorder %v1185_v26, 0.0  ;;  %1378 = vmatpush.bf16.msra.mxu2 %v2546_v12  ;;  %v2696_v22 = vld [vmem:[%s3055_s6] ss:$0 sm:$0xff] }
 0x497   : > { %v3133_v30 = vsel %vm1190_vm3, %v1186_v25, %v1199_v28  ;;  %v3135_v31 = vsel %vm1188_vm4, %v1184_v24, %v1197_v27 }
 0x498   : > { %v3137_v32 = vsel %vm1189_vm5, %v1185_v26, %v1198_v29  ;;  %v1212_v33 = vrot.slane %v3133_v30, 7  ;;  %v1238_v34 = vmul.f32 %v3133_v30, %v3133_v30  ;;  %v1209_v36 = vrot.slane %v3135_v31, 7 }
 0x499   : > { %v1210_v35 = vrot.slane %v3137_v32, 7  ;;  %v1237_v37 = vmul.f32 %v3137_v32, %v3137_v32  ;;  %v1236_v38 = vmul.f32 %v3135_v31, %v3135_v31  ;;  %vm1585_vm5 = vcmask 1043456  }
 0x49a   : > { %v1245_v39 = vrot.slane %v1238_v34, 7 }
 0x49b   : > { %v1213_v40 = vsel %vm1208_vm6, %v1210_v35, %v1212_v33  ;;  %v1243_v41 = vrot.slane %v1237_v37, 7  ;;  %v1242_v42 = vrot.slane %v1236_v38, 7  ;;  %v1211_v43 = vsel %vm1208_vm6, %v1209_v36, %v1210_v35 }
 0x49c   : > { %1230 = vmatpush.msrb.mxu3 %v1213_v40 }
 0x49d   : > { %v1246_v44 = vsel %vm1208_vm6, %v1243_v41, %v1245_v39  ;;  %v1244_v45 = vsel %vm1208_vm6, %v1242_v42, %v1243_v41  ;;  %v2548_v42 = vld [vmem:[%s3015_s2 + $0x8] sm:$0xff] }
 0x49e   : > { %1231 = vmatpush.msrb.mxu3 %v1211_v43  ;;  %1263 = vmatpush.msrb.mxu1 %v1246_v44  ;;  %v2698_v43 = vld [vmem:[%s3020_s20 + $0x1] ss:$0 sm:$0xff]  ;;  %v2697_v44 = vld [vmem:[%s3060_s28] ss:$0 sm:$0xff] }
 0x49f   : > { %2459 = vmatmul.msk.f32.vlgmr.msrb.gmra.mxu3 %vm992_vm9, %v2829_v7 }
 0x4a0   : > { %1264 = vmatpush.msrb.mxu1 %v1244_v45  ;;  %1418 = vmatpush.bf16.msra.mxu3 %v2548_v42 }
 0x4a1   : > { %2460 = vmatmul.msk.f32.vlgmr.msrb.gmra.mxu1 %vm992_vm9, %v2829_v7 }
 0x51e   : > { %v1266_v48 = vpop.f32.mrf.mxu1 }
 0x51f   : > { %v1280_v49 = vsel %vm1070_vm12, %v1266_v48, 0.0 }
 0x522   : > { %v1233_v46 = vpop.f32.mrf.mxu3 }
 0x523   : > { %v1269_v47 = vsel %vm1070_vm12, %v1233_v46, 0.0 }
 0x524   : > { %1270 = vadd.xlane.f32.xlu2 %v1269_v47 }
 0x52c   : > { %1281 = vadd.xlane.f32.xlu2 %v1280_v49 }
 0x544   : > { %1432 = vperm.xlu2 %2687, %v2698_v43  }
 0x597   : > { %v1271_v50 = vpop.xlane.xlu2 %1270 }
 0x598   : > { %v1272_v51 = vrot.slane %v1271_v50, 4 }
 0x59a   : > { %v1273_v52 = vadd.f32 %v1272_v51, %v1271_v50 }
 0x59c   : > { %v1274_v53 = vrot.slane %v1273_v52, 2 }
 0x59e   : > { %v1275_v56 = vadd.f32 %v1274_v53, %v1273_v52 }
 0x59f   : > { %v1282_v57 = vpop.xlane.xlu2 %1281 }
 0x5a0   : > { %v1283_v58 = vrot.slane %v1282_v57, 4  ;;  %v1276_v59 = vrot.slane %v1275_v56, 1 }
 0x5a2   : > { %v1284_v60 = vadd.f32 %v1283_v58, %v1282_v57  ;;  %v1277_v61 = vadd.f32 %v1276_v59, %v1275_v56  ;;  %v2699_v57 = vld [vmem:[%s3010_s21 + $0x1] ss:$0 sm:$0xff] }
 0x5a4   : > { %v1285_v62 = vrot.slane %v1284_v60, 2  ;;  %2571 = vpush %v1277_v61 }
 0x5a6   : > { %v1286_v63 = vadd.f32 %v1285_v62, %v1284_v60 }
 0x5a7   : > { %v1433_v58 = vpop.permute.xlu2 %1432 }
 0x5a8   : > { %v1287_v0 = vrot.slane %v1286_v63, 1 }
 0x5aa   : > { %v1288_v1 = vadd.f32 %v1287_v0, %v1286_v63 }
 0x5ac   : > { %2573 = vpush %v1288_v1 }
 0x5d5   : > { %s2572_s5 = spop %2571 }
 0x5d6   : > { %s1279_s8 = smul.f32 0.001953125, %s2572_s5 }
 0x5d8   : > { %s1291_s10 = smul.f32 %s1279_s8, %s1279_s8  ;;  %v1307_v13 = vstv %s1279_s8 }
 0x5d9   : > { %v1308_v14 = vsub.f32 %v3135_v31, %v1307_v13  ;;  %v1309_v15 = vsub.f32 %v3137_v32, %v1307_v13  ;;  %v1310_v16 = vsub.f32 %v3133_v30, %v1307_v13 }
 0x5dd   : > { %s2574_s11 = spop %2573 }
 0x5de   : > { %s1290_s18 = smul.f32 0.001953125, %s2574_s11 }
 0x5e0   : > { %s1292_s23 = ssub.f32 %s1290_s18, %s1291_s10 }
 0x5e2   : > { %s1293_s3 = smax.f32 %s2830_s0, %s1292_s23 }
 0x5e3   : > { %s1294_s27 = sadd.f32 1e-08, %s1293_s3 }
 0x5e5   : > { %v1295_v2 = vstv %s1294_s27 }
 0x5e6   : > { %2717 = vrsqrt.f32 %v1295_v2  ;;  %vm1302_vm8 = vweird.f32 %v1295_v2 }
 0x5ec   : > { %v2718_v3 = vpop.eup %2717 }
 0x5ed   : > { %v1297_v4 = vmul.f32 %v2718_v3, %v1295_v2  ;;  %vm1303_vm7 = vweird.f32 %v2718_v3 }
 0x5ee   : > { %vm1304_vm10 = vmor %vm1302_vm8, %vm1303_vm7 }
 0x5ef   : > { %v1298_v5 = vmul.f32 %v2718_v3, %v1297_v4 }
 0x5f1   : > { %v1299_v6 = vmul.f32 0.5, %v1298_v5 }
 0x5f3   : > { %v1300_v8 = vsub.f32 1.5, %v1299_v6  ;;  %v2700_v6 = vld [vmem:[%s3020_s20 + $0x2] ss:$0 sm:$0xff] }
 0x5f5   : > { %v1301_v9 = vmul.f32 %v2718_v3, %v1300_v8 }
 0x5f7   : > { %v1305_v10 = vsel %vm1304_vm10, %v2718_v3, %v1301_v9  ;;  %vm1629_vm10 = vcmask 1041408  }
 0x5f8   : > { %2575 = vpush %v1305_v10 }
 0x629   : > { %s2576_s9 = spop %2575 }
 0x62a   : > { %v1311_v18 = vstv %s2576_s9 }
 0x62b   : > { %v1312_v19 = vmul.f32 %v1311_v18, %v1308_v14  ;;  %v1313_v20 = vmul.f32 %v1311_v18, %v1309_v15  ;;  %v1314_v21 = vmul.f32 %v1311_v18, %v1310_v16 }
 0x62d   : > { %v1318_v23 = vmul.f32 %v2695_v17, %v1312_v19  ;;  %v1319_v24 = vmul.f32 %v2695_v17, %v1313_v20  ;;  %v1320_v25 = vmul.f32 %v2695_v17, %v1314_v21 }
 0x62f   : > { %v1324_v26 = vadd.f32 %v2696_v22, %v1318_v23  ;;  %v1325_v27 = vadd.f32 %v2696_v22, %v1319_v24  ;;  %v1326_v28 = vadd.f32 %v2696_v22, %v1320_v25 }
 0x631   : > { %v1327_v29 = vpack.c.bf16 %v1325_v27, %v1324_v26  ;;  %v1328_v33 = vpack.c.bf16 %v1326_v28, %v1326_v28 }
 0x633   : > { %v1339_v31 = vshrl.u32 %v1327_v29, 16  ;;  %v1342_v32 = vshll.u32 %v1327_v29, 16  ;;  %v1347_v34 = vshrl.u32 %v1328_v33, 16  ;;  %v1350_v30 = vshll.u32 %v1328_v33, 16 }
 0x635   : > { %v1341_v35 = vrot.slane %v1339_v31, 3  ;;  %v1344_v36 = vrot.slane %v1342_v32, 4  ;;  %v1349_v37 = vrot.slane %v1347_v34, 3  ;;  %v1352_v38 = vrot.slane %v1350_v30, 4  ;;  %v2701_v34 = vld [vmem:[%s3025_s25 + $0x1] ss:$0 sm:$0xff] }
 0x637   : > { %v1345_v39 = vor.u32 %v1344_v36, %v1341_v35  ;;  %v1353_v40 = vor.u32 %v1352_v38, %v1349_v37  ;;  %v2702_v37 = vld [vmem:[%s3030_s24 + $0x1] ss:$0 sm:$0xff] }
 0x639   : > { %v1354_v41 = vsel %vm1337_vm11, %v1345_v39, %v1353_v40 }
 0x63a   : > { %2469 = vmatmul.msk.bf16.vlgmr.msra.gmra.mxu2 %vm1367_vm13, %v1354_v41 }
 0x6bd   : > { %v1380_v45 = vpop.f32.mrf.mxu2 }
 0x6be   : > { %v1381_v46 = vadd.f32 %v2697_v44, %v1380_v45  ;;  %v1575_v45 = vld [vmem:[#allocation3 + $0x10] sm:$0x1] }
 0x6c0   : > { %v1387_v47 = vadd.f32 %v1381_v46, %v3101_v54  ;;  %v1577_v46 = vunpack.c.l.bf16 %v1575_v45 }
 0x6c2   : > { %1389 = vst.msk [vmem:[#allocation2] sm:$0xff] %vm992_vm9, %v1387_v47 }
 0x6c5   : > { %v1382_v48 = vpop.f32.mrf.mxu2 }
 0x6c6   : > { %v1383_v49 = vadd.f32 %v2697_v44, %v1382_v48  ;;  %v2483_v44 = vld [vmem:[%s3040_s1 + $0x4] sm:$0x7]  ;;  %v1545_v48 = vld [vmem:[#allocation3 + $0x4] sm:$0x8] }
 0x6c7   : > { %v1578_v47 = vperm.slane %v2483_v44, 2 }
 0x6c8   : > { %v1388_v50 = vadd.f32 %v1383_v49, %v3103_v55  ;;  %v1560_v49 = vperm.slane %v2483_v44, 1 }
 0x6c9   : > { %v3174_v51 = vld [vmem:[#allocation2] sm:$0xff] }
 0x6ca   : > { %1390 = vst.msk [vmem:[#allocation2 + $0x8] sm:$0xff] %vm992_vm9, %v1388_v50 }
 0x6d1   : > { %v3176_v52 = vld [vmem:[#allocation2 + $0x8] sm:$0xff] }
 0x6d2   : > { %v1393_v53 = vpack.c.bf16 %v3176_v52, %v3174_v51 }
 0x6d4   : > { %2477 = vmatmul.msk.bf16.vlgmr.msra.gmra.mxu3 %vm992_vm9, %v1393_v53  ;;  %v1548_v53 = vunpack.c.l.bf16 %v1545_v48 }
 0x757   : > { %v1420_v56 = vpop.f32.mrf.mxu3 }
 0x758   : > { %v1421_v54 = vadd.f32 %v2699_v57, %v1420_v56 }
 0x75a   : > { %v1435_v60 = vmul.f32 %v1433_v58, %v1421_v54  ;;  %vm1427_vm14 = vcmp.ge.f32.partialorder %v1421_v54, 0.0 }
 0x75c   : > { %v1437_v63 = vsel %vm1427_vm14, %v1421_v54, %v1435_v60 }
 0x75d   : > { %v1463_v1 = vmul.f32 %v1437_v63, %v1437_v63 }
 0x75f   : > { %v1422_v59 = vpop.f32.mrf.mxu3 }
 0x760   : > { %v1423_v61 = vadd.f32 %v2699_v57, %v1422_v59 }
 0x762   : > { %v1436_v55 = vmul.f32 %v1433_v58, %v1423_v61  ;;  %vm1428_vm15 = vcmp.ge.f32.partialorder %v1423_v61, 0.0  ;;  %v1581_v58 = vmul.f32 %v1578_v47, %v1577_v46 }
 0x764   : > { %v1438_v62 = vsel %vm1428_vm15, %v1423_v61, %v1436_v55  ;;  %v1551_v61 = vperm.slane %v2483_v44, 0 }
 0x765   : > { %1457 = vmatpush.msrb.mxu0 %v1438_v62  ;;  %v1464_v0 = vmul.f32 %v1438_v62, %v1438_v62 }
 0x767   : > { %1458 = vmatpush.msrb.mxu0 %v1437_v63  ;;  %1479 = vmatpush.msra.mxu1 %v1464_v0 }
 0x768   : > { %2481 = vmatmul.msk.f32.vlgmr.msrb.gmra.mxu0 %vm992_vm9, %v2829_v7 }
 0x769   : > { %1480 = vmatpush.msra.mxu1 %v1463_v1  ;;  %v1552_v1 = vmul.f32 %v1551_v61, %v1548_v53 }
 0x76a   : > { %2482 = vmatmul.msk.f32.vlgmr.msra.gmra.mxu1 %vm992_vm9, %v2829_v7 }
 0x7e5   : > { %v1460_v2 = vpop.f32.mrf.mxu0 }
 0x7e6   : > { %v1485_v3 = vsel %vm1070_vm12, %v1460_v2, 0.0 }
 0x7e7   : > { %v1482_v4 = vpop.f32.mrf.mxu1  ;;  %1486 = vadd.xlane.f32.xlu1 %v1485_v3  ;;  %v1589_v3 = vrot.slane %v1581_v58, 4 }
 0x7e8   : > { %v1496_v5 = vsel %vm1070_vm12, %v1482_v4, 0.0 }
 0x7e9   : > { %1497 = vadd.xlane.f32.xlu2 %v1496_v5 }
 0x801   : > { %1842 = vperm.xlu2 %2687, %v2700_v6  }
 0x85a   : > { %v1487_v8 = vpop.xlane.xlu1 %1486 }
 0x85b   : > { %v1488_v9 = vrot.slane %v1487_v8, 4 }
 0x85c   : > { %v1498_v10 = vpop.xlane.xlu2 %1497 }
 0x85d   : > { %v1489_v11 = vadd.f32 %v1488_v9, %v1487_v8  ;;  %v1499_v12 = vrot.slane %v1498_v10, 4 }
 0x85f   : > { %v1490_v13 = vrot.slane %v1489_v11, 2  ;;  %v1500_v14 = vadd.f32 %v1499_v12, %v1498_v10 }
 0x861   : > { %v1501_v15 = vrot.slane %v1500_v14, 2  ;;  %v1491_v16 = vadd.f32 %v1490_v13, %v1489_v11  ;;  %v2703_v13 = vld [vmem:[%s3035_s17 + $0x1] ss:$0 sm:$0xff] }
 0x863   : > { %v1492_v17 = vrot.slane %v1491_v16, 1  ;;  %v1502_v18 = vadd.f32 %v1501_v15, %v1500_v14 }
 0x865   : > { %v1493_v19 = vadd.f32 %v1492_v17, %v1491_v16  ;;  %v1503_v20 = vrot.slane %v1502_v18, 1 }
 0x867   : > { %2577 = vpush %v1493_v19  ;;  %v1504_v21 = vadd.f32 %v1503_v20, %v1502_v18 }
 0x869   : > { %2579 = vpush %v1504_v21 }
 0x898   : > { %s2578_s4 = spop %2577 }
 0x899   : > { %s1495_s5 = smul.f32 0.001953125, %s2578_s4 }
 0x89a   : > { %s2580_s20 = spop %2579 }
 0x89b   : > { %s1507_s8 = smul.f32 %s1495_s5, %s1495_s5  ;;  %v1523_v33 = vstv %s1495_s5 }
 0x89c   : > { %s1506_s10 = smul.f32 0.001953125, %s2580_s20  ;;  %v1524_v31 = vsub.f32 %v1437_v63, %v1523_v33  ;;  %v1525_v32 = vsub.f32 %v1438_v62, %v1523_v33 }
 0x89e   : > { %s1508_s11 = ssub.f32 %s1506_s10, %s1507_s8 }
 0x8a0   : > { %s1509_s18 = smax.f32 %s2830_s0, %s1508_s11 }
 0x8a1   : > { %s1510_s23 = sadd.f32 1e-08, %s1509_s18 }
 0x8a3   : > { %v1511_v22 = vstv %s1510_s23 }
 0x8a4   : > { %2719 = vrsqrt.f32 %v1511_v22  ;;  %vm1518_vm3 = vweird.f32 %v1511_v22 }
 0x8aa   : > { %v2720_v23 = vpop.eup %2719 }
 0x8ab   : > { %v1513_v24 = vmul.f32 %v2720_v23, %v1511_v22  ;;  %vm1519_vm1 = vweird.f32 %v2720_v23 }
 0x8ac   : > { %vm1520_vm4 = vmor %vm1518_vm3, %vm1519_vm1  ;;  %vm1762_vm1 = vcmask 1044480  }
 0x8ad   : > { %v1514_v25 = vmul.f32 %v2720_v23, %v1513_v24 }
 0x8af   : > { %v1515_v26 = vmul.f32 0.5, %v1514_v25 }
 0x8b1   : > { %v1516_v27 = vsub.f32 1.5, %v1515_v26 }
 0x8b3   : > { %v1517_v28 = vmul.f32 %v2720_v23, %v1516_v27 }
 0x8b5   : > { %v1521_v29 = vsel %vm1520_vm4, %v2720_v23, %v1517_v28  ;;  %v1614_v23 = vpop.permute.xlu0 %1613 }
 0x8b6   : > { %2581 = vpush %v1521_v29 }
 0x8e7   : > { %s2582_s3 = spop %2581 }
 0x8e8   : > { %v1526_v30 = vstv %s2582_s3 }
 0x8e9   : > { %v1527_v35 = vmul.f32 %v1526_v30, %v1524_v31  ;;  %v1528_v36 = vmul.f32 %v1526_v30, %v1525_v32 }
 0x8eb   : > { %v1532_v38 = vmul.f32 %v2701_v34, %v1527_v35  ;;  %v1533_v39 = vmul.f32 %v2701_v34, %v1528_v36 }
 0x8ed   : > { %v1537_v40 = vadd.f32 %v2702_v37, %v1532_v38  ;;  %v1538_v41 = vadd.f32 %v2702_v37, %v1533_v39 }
 0x8ef   : > { %v1539_v42 = vpack.c.bf16 %v1537_v40, %v1537_v40  ;;  %v1540_v43 = vpack.c.bf16 %v1538_v41, %v1538_v41 }
 0x8f1   : > { %1541 = vst.msk [vmem:[#allocation3 + $0x8] sm:$0xf] %vm1127_vm0, %v1539_v42 }
 0x8f2   : > { %1542 = vst.msk [vmem:[#allocation3 + $0xc] sm:$0xf] %vm1127_vm0, %v1540_v43 }
 0x8f8   : > { %v1574_v50 = vld [vmem:[#allocation3 + $0x8] sm:$0xe] }
 0x8f9   : > { %v1546_v56 = vld [vmem:[#allocation3 + $0x8] sm:$0xff]   ;;  %v1576_v54 = vunpack.c.l.bf16 %v1574_v50 }
 0x8fa   : > { %v1547_v57 = vld [vmem:[#allocation3 + $0xc] sm:$0x7]  ;;  %v1549_v59 = vunpack.c.l.bf16 %v1546_v56  ;;  %v1559_v55 = vunpack.c.h.bf16 %v1546_v56 }
 0x8fb   : > { %v1550_v60 = vunpack.c.l.bf16 %v1547_v57  ;;  %v1579_v62 = vmul.f32 %v1578_v47, %v1576_v54 }
 0x8fc   : > { %v1561_v63 = vmul.f32 %v1560_v49, %v1549_v59  ;;  %v1562_v0 = vmul.f32 %v1560_v49, %v1559_v55  ;;  %v1580_v2 = vmul.f32 %v1578_v47, %v1559_v55  ;;  %v1553_v9 = vmul.f32 %v1551_v61, %v1549_v59 }
 0x8fd   : > { %v1554_v4 = vmul.f32 %v1551_v61, %v1550_v60  ;;  %v1586_v8 = vrot.slane %v1579_v62, 4 }
 0x8fe   : > { %v1565_v5 = vrot.slane %v1561_v63, 2  ;;  %v1566_v6 = vrot.slane %v1562_v0, 2  ;;  %v1587_v10 = vrot.slane %v1580_v2, 4 }
 0x900   : > { %v1567_v11 = vsel %vm1168_vm2, %v1565_v5, %v1566_v6  ;;  %v1573_v12 = vadd.f32 %v1566_v6, %v1554_v4  ;;  %v1571_v14 = vadd.f32 %v1565_v5, %v1552_v1  ;;  %v1590_v16 = vsel %vm1585_vm5, %v1587_v10, %v1589_v3 }
 0x901   : > { %v1572_v15 = vadd.f32 %v1567_v11, %v1553_v9  ;;  %v1588_v17 = vsel %vm1585_vm5, %v1586_v8, %v1587_v10  ;;  %v2550_v9 = vld [vmem:[%s3065_s22 + $0x18] sm:$0xff]  ;;  %v2549_v10 = vld [vmem:[%s3065_s22 + $0x10] sm:$0xff] }
 0x902   : > { %v1596_v18 = vadd.f32 %v1590_v16, %v1573_v12  ;;  %v1594_v19 = vadd.f32 %v1586_v8, %v1571_v14  ;;  %1787 = vmatpush.bf16.msrb.mxu2 %v2550_v9 }
 0x903   : > { %v1595_v20 = vadd.f32 %v1588_v17, %v1572_v15  ;;  %v2704_v15 = vld [vmem:[%s3050_s26 + $0x1] ss:$0 sm:$0xff] }
 0x904   : > { %v1604_v21 = vadd.f32 %v2703_v13, %v1596_v18  ;;  %v1602_v22 = vadd.f32 %v2703_v13, %v1594_v19 }
 0x905   : > { %v1603_v24 = vadd.f32 %v2703_v13, %v1595_v20  ;;  %v2705_v20 = vld [vmem:[%s3055_s6 + $0x1] ss:$0 sm:$0xff] }
 0x906   : > { %vm1609_vm6 = vcmp.ge.f32.partialorder %v1604_v21, 0.0  ;;  %v1618_v25 = vmul.f32 %v1614_v23, %v1604_v21  ;;  %vm1607_vm7 = vcmp.ge.f32.partialorder %v1602_v22, 0.0  ;;  %v1616_v26 = vmul.f32 %v1614_v23, %v1602_v22  ;;  %1788 = vmatpush.bf16.msrb.mxu2 %v2549_v10 }
 0x907   : > { %vm1608_vm8 = vcmp.ge.f32.partialorder %v1603_v24, 0.0  ;;  %v1617_v27 = vmul.f32 %v1614_v23, %v1603_v24 }
 0x908   : > { %v3199_v28 = vsel %vm1609_vm6, %v1604_v21, %v1618_v25  ;;  %v3201_v29 = vsel %vm1607_vm7, %v1602_v22, %v1616_v26 }
 0x909   : > { %v3203_v33 = vsel %vm1608_vm8, %v1603_v24, %v1617_v27  ;;  %v1633_v31 = vrot.slane %v3199_v28, 6  ;;  %v1659_v32 = vmul.f32 %v3199_v28, %v3199_v28  ;;  %v1630_v30 = vrot.slane %v3201_v29, 6 }
 0x90a   : > { %v1631_v34 = vrot.slane %v3203_v33, 6  ;;  %v1658_v35 = vmul.f32 %v3203_v33, %v3203_v33  ;;  %v1657_v36 = vmul.f32 %v3201_v29, %v3201_v29 }
 0x90b   : > { %v1666_v37 = vrot.slane %v1659_v32, 6  ;;  %v2551_v32 = vld [vmem:[%s3015_s2 + $0x10] sm:$0xff] }
 0x90c   : > { %v1634_v38 = vsel %vm1629_vm10, %v1631_v34, %v1633_v31  ;;  %v1664_v39 = vrot.slane %v1658_v35, 6  ;;  %v1663_v40 = vrot.slane %v1657_v36, 6  ;;  %v1632_v41 = vsel %vm1629_vm10, %v1630_v30, %v1631_v34  ;;  %1828 = vmatpush.bf16.msrb.mxu3 %v2551_v32  ;;  %v2706_v34 = vld [vmem:[%s3060_s28 + $0x1] ss:$0 sm:$0xff] }
 0x90d   : > { %1651 = vmatpush.msra.mxu0 %v1634_v38 }
 0x90e   : > { %v1667_v42 = vsel %vm1629_vm10, %v1664_v39, %v1666_v37  ;;  %v1665_v43 = vsel %vm1629_vm10, %v1663_v40, %v1664_v39 }
 0x90f   : > { %1652 = vmatpush.msra.mxu0 %v1632_v41  ;;  %1684 = vmatpush.msrb.mxu1 %v1667_v42 }
 0x910   : > { %2488 = vmatmul.msk.f32.vlgmr.msra.gmra.mxu0 %vm992_vm9, %v2829_v7 }
 0x911   : > { %1685 = vmatpush.msrb.mxu1 %v1665_v43 }
 0x912   : > { %2489 = vmatmul.msk.f32.vlgmr.msrb.gmra.mxu1 %vm992_vm9, %v2829_v7 }
 0x98d   : > { %v1654_v44 = vpop.f32.mrf.mxu0 }
 0x98e   : > { %v1690_v45 = vsel %vm1070_vm12, %v1654_v44, 0.0  ;;  %v2707_v44 = vld [vmem:[%s3010_s21 + $0x2] ss:$0 sm:$0xff] }
 0x98f   : > { %v1687_v46 = vpop.f32.mrf.mxu1  ;;  %1691 = vadd.xlane.f32.xlu0 %v1690_v45  ;;  %v1843_v45 = vpop.permute.xlu2 %1842 }
 0x990   : > { %v1701_v47 = vsel %vm1070_vm12, %v1687_v46, 0.0 }
 0x991   : > { %1702 = vadd.xlane.f32.xlu1 %v1701_v47 }
 0xa02   : > { %v1692_v48 = vpop.xlane.xlu0 %1691 }
 0xa03   : > { %v1693_v49 = vrot.slane %v1692_v48, 4 }
 0xa04   : > { %v1703_v50 = vpop.xlane.xlu1 %1702 }
 0xa05   : > { %v1694_v53 = vadd.f32 %v1693_v49, %v1692_v48  ;;  %v1704_v56 = vrot.slane %v1703_v50, 4 }
 0xa07   : > { %v1695_v57 = vrot.slane %v1694_v53, 2  ;;  %v1705_v54 = vadd.f32 %v1704_v56, %v1703_v50 }
 0xa09   : > { %v1706_v58 = vrot.slane %v1705_v54, 2  ;;  %v1696_v59 = vadd.f32 %v1695_v57, %v1694_v53 }
 0xa0b   : > { %v1697_v60 = vrot.slane %v1696_v59, 1  ;;  %v1707_v61 = vadd.f32 %v1706_v58, %v1705_v54 }
 0xa0d   : > { %v1698_v55 = vadd.f32 %v1697_v60, %v1696_v59  ;;  %v1708_v62 = vrot.slane %v1707_v61, 1  ;;  %v2708_v60 = vld [vmem:[%s3045_s29 + $0x2] ss:$0 sm:$0xff] }
 0xa0f   : > { %2583 = vpush %v1698_v55  ;;  %v1709_v63 = vadd.f32 %v1708_v62, %v1707_v61 }
 0xa11   : > { %2585 = vpush %v1709_v63 }
 0xa40   : > { %s2584_s27 = spop %2583 }
 0xa41   : > { %s1700_s9 = smul.f32 0.001953125, %s2584_s27 }
 0xa42   : > { %s2586_s4 = spop %2585 }
 0xa43   : > { %s1712_s5 = smul.f32 %s1700_s9, %s1700_s9  ;;  %v1728_v11 = vstv %s1700_s9 }
 0xa44   : > { %s1711_s20 = smul.f32 0.001953125, %s2586_s4  ;;  %v1729_v12 = vsub.f32 %v3201_v29, %v1728_v11  ;;  %v1730_v13 = vsub.f32 %v3203_v33, %v1728_v11  ;;  %v1731_v14 = vsub.f32 %v3199_v28, %v1728_v11 }
 0xa46   : > { %s1713_s8 = ssub.f32 %s1711_s20, %s1712_s5 }
 0xa48   : > { %s1714_s10 = smax.f32 %s2830_s0, %s1713_s8 }
 0xa49   : > { %s1715_s11 = sadd.f32 1e-08, %s1714_s10 }
 0xa4b   : > { %v1716_v0 = vstv %s1715_s11 }
 0xa4c   : > { %2721 = vrsqrt.f32 %v1716_v0  ;;  %vm1723_vm14 = vweird.f32 %v1716_v0 }
 0xa52   : > { %v2722_v1 = vpop.eup %2721 }
 0xa53   : > { %v1718_v2 = vmul.f32 %v2722_v1, %v1716_v0  ;;  %vm1724_vm11 = vweird.f32 %v2722_v1 }
 0xa54   : > { %vm1725_vm15 = vmor %vm1723_vm14, %vm1724_vm11 }
 0xa55   : > { %v1719_v3 = vmul.f32 %v2722_v1, %v1718_v2 }
 0xa57   : > { %v1720_v4 = vmul.f32 0.5, %v1719_v3 }
 0xa59   : > { %v1721_v5 = vsub.f32 1.5, %v1720_v4 }
 0xa5b   : > { %v1722_v6 = vmul.f32 %v2722_v1, %v1721_v5 }
 0xa5d   : > { %v1726_v8 = vsel %vm1725_vm15, %v2722_v1, %v1722_v6 }
 0xa5e   : > { %2587 = vpush %v1726_v8 }
 0xa8f   : > { %s2588_s18 = spop %2587 }
 0xa90   : > { %v1732_v16 = vstv %s2588_s18 }
 0xa91   : > { %v1733_v17 = vmul.f32 %v1732_v16, %v1729_v12  ;;  %v1734_v18 = vmul.f32 %v1732_v16, %v1730_v13  ;;  %v1735_v19 = vmul.f32 %v1732_v16, %v1731_v14 }
 0xa93   : > { %v1739_v21 = vmul.f32 %v2704_v15, %v1733_v17  ;;  %v1740_v22 = vmul.f32 %v2704_v15, %v1734_v18  ;;  %v1741_v23 = vmul.f32 %v2704_v15, %v1735_v19 }
 0xa95   : > { %v1745_v24 = vadd.f32 %v2705_v20, %v1739_v21  ;;  %v1746_v25 = vadd.f32 %v2705_v20, %v1740_v22  ;;  %v1747_v26 = vadd.f32 %v2705_v20, %v1741_v23  ;;  %v2709_v22 = vld [vmem:[%s3025_s25 + $0x2] ss:$0 sm:$0xff] }
 0xa97   : > { %v1749_v27 = vpack.c.bf16 %v1747_v26, %v1747_v26  ;;  %v1748_v29 = vpack.c.bf16 %v1746_v25, %v1745_v24  ;;  %v2710_v26 = vld [vmem:[%s3030_s24 + $0x2] ss:$0 sm:$0xff] }
 0xa99   : > { %v1764_v33 = vrot.slane %v1749_v27, 3  ;;  %v1763_v31 = vrot.slane %v1748_v29, 3 }
 0xa9b   : > { %v1765_v28 = vsel %vm1762_vm1, %v1763_v31, %v1764_v33 }
 0xa9c   : > { %2503 = vmatmul.msk.bf16.vlgmr.msrb.gmra.mxu2 %vm1367_vm13, %v1765_v28 }
 0xb1f   : > { %v1790_v30 = vpop.f32.mrf.mxu2 }
 0xb20   : > { %v1791_v35 = vadd.f32 %v2706_v34, %v1790_v30  ;;  %v1955_v30 = vld [vmem:[#allocation3 + $0x4] sm:$0xc] }
 0xb22   : > { %v1797_v36 = vadd.f32 %v1791_v35, %v3174_v51  ;;  %v1985_v35 = vld [vmem:[#allocation3 + $0x10] sm:$0x3] }
 0xb24   : > { %1799 = vst.msk [vmem:[#allocation2] sm:$0xff] %vm992_vm9, %v1797_v36 }
 0xb27   : > { %v1792_v37 = vpop.f32.mrf.mxu2 }
 0xb28   : > { %v1793_v38 = vadd.f32 %v2706_v34, %v1792_v37  ;;  %v2517_v34 = vld [vmem:[%s3040_s1 + $0x8] sm:$0x7]  ;;  %v1958_v37 = vunpack.c.l.bf16 %v1955_v30 }
 0xb29   : > { %v1970_v36 = vperm.slane %v2517_v34, 1 }
 0xb2a   : > { %v1798_v39 = vadd.f32 %v1793_v38, %v3176_v52 }
 0xb2b   : > { %v3239_v40 = vld [vmem:[#allocation2] sm:$0xff] }
 0xb2c   : > { %1800 = vst.msk [vmem:[#allocation2 + $0x8] sm:$0xff] %vm992_vm9, %v1798_v39 }
 0xb33   : > { %v3241_v41 = vld [vmem:[#allocation2 + $0x8] sm:$0xff] }
 0xb34   : > { %v1803_v42 = vpack.c.bf16 %v3241_v41, %v3239_v40 }
 0xb36   : > { %2511 = vmatmul.msk.bf16.vlgmr.msrb.gmra.mxu3 %vm992_vm9, %v1803_v42  ;;  %v1961_v42 = vperm.slane %v2517_v34, 0 }
 0xbb9   : > { %v1830_v43 = vpop.f32.mrf.mxu3 }
 0xbba   : > { %v1831_v51 = vadd.f32 %v2707_v44, %v1830_v43 }
 0xbbc   : > { %v1845_v47 = vmul.f32 %v1843_v45, %v1831_v51  ;;  %vm1837_vm3 = vcmp.ge.f32.partialorder %v1831_v51, 0.0 }
 0xbbe   : > { %v1847_v50 = vsel %vm1837_vm3, %v1831_v51, %v1845_v47  ;;  %v1988_v47 = vperm.slane %v2517_v34, 2 }
 0xbbf   : > { %v1873_v56 = vmul.f32 %v1847_v50, %v1847_v50 }
 0xbc1   : > { %v1832_v46 = vpop.f32.mrf.mxu3 }
 0xbc2   : > { %v1833_v48 = vadd.f32 %v2707_v44, %v1832_v46  ;;  %v1987_v46 = vunpack.c.l.bf16 %v1985_v35 }
 0xbc4   : > { %vm1838_vm4 = vcmp.ge.f32.partialorder %v1833_v48, 0.0  ;;  %v1846_v52 = vmul.f32 %v1843_v45, %v1833_v48 }
 0xbc6   : > { %v1848_v49 = vsel %vm1838_vm4, %v1833_v48, %v1846_v52 }
 0xbc7   : > { %1867 = vmatpush.msrb.mxu0 %v1848_v49  ;;  %v1874_v53 = vmul.f32 %v1848_v49, %v1848_v49 }
 0xbc9   : > { %1868 = vmatpush.msrb.mxu0 %v1847_v50  ;;  %1889 = vmatpush.msra.mxu1 %v1874_v53 }
 0xbca   : > { %2515 = vmatmul.msk.f32.vlgmr.msrb.gmra.mxu0 %vm992_vm9, %v2829_v7 }
 0xbcb   : > { %1890 = vmatpush.msra.mxu1 %v1873_v56 }
 0xbcc   : > { %2516 = vmatmul.msk.f32.vlgmr.msra.gmra.mxu1 %vm992_vm9, %v2829_v7 }
 0xc47   : > { %v1870_v57 = vpop.f32.mrf.mxu0 }
 0xc48   : > { %v1895_v54 = vsel %vm1070_vm12, %v1870_v57, 0.0 }
 0xc49   : > { %1896 = vadd.xlane.f32.xlu1 %v1895_v54  ;;  %v1892_v58 = vpop.f32.mrf.mxu1  ;;  %v1991_v54 = vmul.f32 %v1988_v47, %v1987_v46 }
 0xc4a   : > { %v1906_v59 = vsel %vm1070_vm12, %v1892_v58, 0.0 }
 0xc51   : > { %1907 = vadd.xlane.f32.xlu1 %v1906_v59 }
 0xc6a   : > { %2011 = vperm.xlu1 %2686, %v2708_v60  }
 0xcbc   : > { %v1897_v61 = vpop.xlane.xlu1 %1896 }
 0xcbd   : > { %v1898_v55 = vrot.slane %v1897_v61, 4 }
 0xcbf   : > { %v1899_v62 = vadd.f32 %v1898_v55, %v1897_v61  ;;  %v2711_v61 = vld [vmem:[%s3035_s17 + $0x2] ss:$0 sm:$0xff] }
 0xcc1   : > { %v1900_v63 = vrot.slane %v1899_v62, 2 }
 0xcc3   : > { %v1901_v0 = vadd.f32 %v1900_v63, %v1899_v62 }
 0xcc4   : > { %v1908_v1 = vpop.xlane.xlu1 %1907 }
 0xcc5   : > { %v1909_v2 = vrot.slane %v1908_v1, 4  ;;  %v1902_v3 = vrot.slane %v1901_v0, 1 }
 0xcc7   : > { %v1910_v4 = vadd.f32 %v1909_v2, %v1908_v1  ;;  %v1903_v5 = vadd.f32 %v1902_v3, %v1901_v0 }
 0xcc9   : > { %v1911_v6 = vrot.slane %v1910_v4, 2  ;;  %2589 = vpush %v1903_v5 }
 0xccb   : > { %v1912_v8 = vadd.f32 %v1911_v6, %v1910_v4 }
 0xccd   : > { %v1913_v9 = vrot.slane %v1912_v8, 1 }
 0xccf   : > { %v1914_v10 = vadd.f32 %v1913_v9, %v1912_v8 }
 0xcd1   : > { %2591 = vpush %v1914_v10 }
 0xcdc   : > { %v2012_v6 = vpop.permute.xlu1 %2011 }
 0xcfa   : > { %s2590_s21 = spop %2589 }
 0xcfb   : > { %s1905_s2 = smul.f32 0.001953125, %s2590_s21 }
 0xcfd   : > { %s1917_s29 = smul.f32 %s1905_s2, %s1905_s2  ;;  %v1933_v19 = vstv %s1905_s2 }
 0xcfe   : > { %v1934_v20 = vsub.f32 %v1847_v50, %v1933_v19  ;;  %v1935_v21 = vsub.f32 %v1848_v49, %v1933_v19  ;;  %v1962_v49 = vmul.f32 %v1961_v42, %v1958_v37 }
 0xd02   : > { %s2592_s23 = spop %2591 }
 0xd03   : > { %s1916_s3 = smul.f32 0.001953125, %s2592_s23 }
 0xd05   : > { %s1918_s27 = ssub.f32 %s1916_s3, %s1917_s29 }
 0xd07   : > { %s1919_s9 = smax.f32 %s2830_s0, %s1918_s27 }
 0xd08   : > { %s1920_s4 = sadd.f32 1e-08, %s1919_s9 }
 0xd0a   : > { %v1921_v11 = vstv %s1920_s4 }
 0xd0b   : > { %2723 = vrsqrt.f32 %v1921_v11  ;;  %vm1928_vm7 = vweird.f32 %v1921_v11 }
 0xd11   : > { %v2724_v12 = vpop.eup %2723 }
 0xd12   : > { %v1923_v13 = vmul.f32 %v2724_v12, %v1921_v11  ;;  %vm1929_vm6 = vweird.f32 %v2724_v12 }
 0xd13   : > { %vm1930_vm8 = vmor %vm1928_vm7, %vm1929_vm6 }
 0xd14   : > { %v1924_v14 = vmul.f32 %v2724_v12, %v1923_v13 }
 0xd16   : > { %v1925_v15 = vmul.f32 0.5, %v1924_v14 }
 0xd18   : > { %v1926_v16 = vsub.f32 1.5, %v1925_v15 }
 0xd1a   : > { %v1927_v17 = vmul.f32 %v2724_v12, %v1926_v16 }
 0xd1c   : > { %v1931_v18 = vsel %vm1930_vm8, %v2724_v12, %v1927_v17 }
 0xd1d   : > { %2593 = vpush %v1931_v18 }
 0xd4e   : > { %s2594_s5 = spop %2593 }
 0xd4f   : > { %v1936_v23 = vstv %s2594_s5 }
 0xd50   : > { %v1937_v24 = vmul.f32 %v1936_v23, %v1934_v20  ;;  %v1938_v25 = vmul.f32 %v1936_v23, %v1935_v21 }
 0xd52   : > { %v1942_v27 = vmul.f32 %v2709_v22, %v1937_v24  ;;  %v1943_v29 = vmul.f32 %v2709_v22, %v1938_v25 }
 0xd54   : > { %v1947_v33 = vadd.f32 %v2710_v26, %v1942_v27  ;;  %v1948_v31 = vadd.f32 %v2710_v26, %v1943_v29 }
 0xd56   : > { %v1949_v28 = vpack.c.bf16 %v1947_v33, %v1947_v33  ;;  %v1950_v32 = vpack.c.bf16 %v1948_v31, %v1948_v31 }
 0xd58   : > { %1951 = vst.msk [vmem:[#allocation3 + $0x8] sm:$0xf] %vm1127_vm0, %v1949_v28 }
 0xd59   : > { %1952 = vst.msk [vmem:[#allocation3 + $0xc] sm:$0xf] %vm1127_vm0, %v1950_v32 }
 0xd5f   : > { %v1984_v43 = vld [vmem:[#allocation3 + $0x8] sm:$0xc] }
 0xd60   : > { %v1956_v38 = vld [vmem:[#allocation3 + $0x8] sm:$0xff]   ;;  %v1986_v50 = vunpack.c.l.bf16 %v1984_v43 }
 0xd61   : > { %v1957_v39 = vld [vmem:[#allocation3 + $0xc] sm:$0x3]  ;;  %v1959_v44 = vunpack.c.l.bf16 %v1956_v38  ;;  %v1969_v45 = vunpack.c.h.bf16 %v1956_v38 }
 0xd62   : > { %v1960_v51 = vunpack.c.l.bf16 %v1957_v39  ;;  %v1989_v62 = vmul.f32 %v1988_v47, %v1986_v50 }
 0xd63   : > { %v1971_v48 = vmul.f32 %v1970_v36, %v1959_v44  ;;  %v1972_v52 = vmul.f32 %v1970_v36, %v1969_v45  ;;  %v1963_v58 = vmul.f32 %v1961_v42, %v1959_v44  ;;  %v1990_v0 = vmul.f32 %v1988_v47, %v1969_v45 }
 0xd64   : > { %v1964_v53 = vmul.f32 %v1961_v42, %v1960_v51 }
 0xd65   : > { %v1975_v56 = vrot.slane %v1971_v48, 4  ;;  %v1976_v57 = vrot.slane %v1972_v52, 4 }
 0xd67   : > { %v1977_v59 = vsel %vm1585_vm5, %v1975_v56, %v1976_v57  ;;  %v1983_v60 = vadd.f32 %v1976_v57, %v1964_v53  ;;  %v1981_v55 = vadd.f32 %v1975_v56, %v1962_v49  ;;  %v2553_v57 = vld [vmem:[%s3065_s22 + $0x28] sm:$0xff] }
 0xd68   : > { %v1982_v63 = vadd.f32 %v1977_v59, %v1963_v58  ;;  %2184 = vmatpush.bf16.msra.mxu2 %v2553_v57 }
 0xd69   : > { %v1994_v1 = vadd.f32 %v1991_v54, %v1983_v60  ;;  %v1992_v2 = vadd.f32 %v1989_v62, %v1981_v55  ;;  %v2552_v54 = vld [vmem:[%s3065_s22 + $0x20] sm:$0xff] }
 0xd6a   : > { %v1993_v3 = vadd.f32 %v1990_v0, %v1982_v63  ;;  %v2712_v55 = vld [vmem:[%s3050_s26 + $0x2] ss:$0 sm:$0xff] }
 0xd6b   : > { %v2002_v4 = vadd.f32 %v2711_v61, %v1994_v1  ;;  %v2000_v5 = vadd.f32 %v2711_v61, %v1992_v2  ;;  %v2713_v2 = vld [vmem:[%s3055_s6 + $0x2] ss:$0 sm:$0xff] }
 0xd6c   : > { %v2001_v8 = vadd.f32 %v2711_v61, %v1993_v3  ;;  %2185 = vmatpush.bf16.msra.mxu2 %v2552_v54 }
 0xd6d   : > { %vm2007_vm0 = vcmp.ge.f32.partialorder %v2002_v4, 0.0  ;;  %v2016_v9 = vmul.f32 %v2012_v6, %v2002_v4  ;;  %vm2005_vm10 = vcmp.ge.f32.partialorder %v2000_v5, 0.0  ;;  %v2014_v10 = vmul.f32 %v2012_v6, %v2000_v5 }
 0xd6e   : > { %vm2006_vm11 = vcmp.ge.f32.partialorder %v2001_v8, 0.0  ;;  %v2015_v11 = vmul.f32 %v2012_v6, %v2001_v8 }
 0xd6f   : > { %v3262_v12 = vsel %vm2007_vm0, %v2002_v4, %v2016_v9  ;;  %v3264_v13 = vsel %vm2005_vm10, %v2000_v5, %v2014_v10 }
 0xd70   : > { %v3266_v14 = vsel %vm2006_vm11, %v2001_v8, %v2015_v11  ;;  %v2030_v15 = vrot.slane %v3262_v12, 4  ;;  %v2056_v16 = vmul.f32 %v3262_v12, %v3262_v12  ;;  %v2027_v18 = vrot.slane %v3264_v13, 4 }
 0xd71   : > { %v2028_v17 = vrot.slane %v3266_v14, 4  ;;  %v2055_v19 = vmul.f32 %v3266_v14, %v3266_v14  ;;  %v2054_v20 = vmul.f32 %v3264_v13, %v3264_v13 }
 0xd72   : > { %v2063_v21 = vrot.slane %v2056_v16, 4 }
 0xd73   : > { %v2031_v22 = vsel %vm1585_vm5, %v2028_v17, %v2030_v15  ;;  %v2061_v23 = vrot.slane %v2055_v19, 4  ;;  %v2060_v24 = vrot.slane %v2054_v20, 4  ;;  %v2029_v25 = vsel %vm1585_vm5, %v2027_v18, %v2028_v17 }
 0xd74   : > { %2048 = vmatpush.msra.mxu0 %v2031_v22 }
 0xd75   : > { %v2064_v26 = vsel %vm1585_vm5, %v2061_v23, %v2063_v21  ;;  %v2062_v27 = vsel %vm1585_vm5, %v2060_v24, %v2061_v23 }
 0xd76   : > { %2049 = vmatpush.msra.mxu0 %v2029_v25  ;;  %2081 = vmatpush.msrb.mxu1 %v2064_v26 }
 0xd77   : > { %2522 = vmatmul.msk.f32.vlgmr.msra.gmra.mxu0 %vm992_vm9, %v2829_v7 }
 0xd78   : > { %2082 = vmatpush.msrb.mxu1 %v2062_v27 }
 0xd79   : > { %2523 = vmatmul.msk.f32.vlgmr.msrb.gmra.mxu1 %vm992_vm9, %v2829_v7 }
 0xdf4   : > { %v2051_v29 = vpop.f32.mrf.mxu0 }
 0xdf5   : > { %v2087_v33 = vsel %vm1070_vm12, %v2051_v29, 0.0 }
 0xdf6   : > { %v2084_v31 = vpop.f32.mrf.mxu1  ;;  %2088 = vadd.xlane.f32.xlu2 %v2087_v33 }
 0xdf7   : > { %v2098_v28 = vsel %vm1070_vm12, %v2084_v31, 0.0 }
 0xdf8   : > { %2099 = vadd.xlane.f32.xlu0 %v2098_v28 }
 0xe69   : > { %v2089_v32 = vpop.xlane.xlu2 %2088 }
 0xe6a   : > { %v2090_v34 = vrot.slane %v2089_v32, 4 }
 0xe6b   : > { %v2100_v30 = vpop.xlane.xlu0 %2099 }
 0xe6c   : > { %v2091_v35 = vadd.f32 %v2090_v34, %v2089_v32  ;;  %v2101_v36 = vrot.slane %v2100_v30, 4 }
 0xe6e   : > { %v2092_v37 = vrot.slane %v2091_v35, 2  ;;  %v2102_v38 = vadd.f32 %v2101_v36, %v2100_v30 }
 0xe70   : > { %v2093_v39 = vadd.f32 %v2092_v37, %v2091_v35  ;;  %v2103_v42 = vrot.slane %v2102_v38, 2 }
 0xe72   : > { %v2104_v43 = vadd.f32 %v2103_v42, %v2102_v38  ;;  %v2094_v44 = vrot.slane %v2093_v39, 1 }
 0xe74   : > { %v2095_v7 = vadd.f32 %v2094_v44, %v2093_v39  ;;  %v2105_v51 = vrot.slane %v2104_v43, 1 }
 0xe76   : > { %2595 = vpush %v2095_v7  ;;  %v2106_v45 = vadd.f32 %v2105_v51, %v2104_v43 }
 0xe78   : > { %2597 = vpush %v2106_v45 }
 0xea7   : > { %s2596_s25 = spop %2595 }
 0xea8   : > { %s2097_s24 = smul.f32 0.001953125, %s2596_s25 }
 0xea9   : > { %s2598_s17 = spop %2597 }
 0xeaa   : > { %s2109_s1 = smul.f32 %s2097_s24, %s2097_s24  ;;  %v2125_v58 = vstv %s2097_s24 }
 0xeab   : > { %s2108_s20 = smul.f32 0.001953125, %s2598_s17  ;;  %v2126_v59 = vsub.f32 %v3264_v13, %v2125_v58  ;;  %v2127_v60 = vsub.f32 %v3266_v14, %v2125_v58  ;;  %v2128_v61 = vsub.f32 %v3262_v12, %v2125_v58  ;;  %v2714_v12 = vld [vmem:[%s3060_s28 + $0x2] ss:$0 sm:$0xff] }
 0xead   : > { %s2110_s8 = ssub.f32 %s2108_s20, %s2109_s1 }
 0xeaf   : > { %s2111_s10 = smax.f32 %s2830_s0, %s2110_s8 }
 0xeb0   : > { %s2112_s11 = sadd.f32 1e-08, %s2111_s10 }
 0xeb2   : > { %v2113_v46 = vstv %s2112_s11 }
 0xeb3   : > { %2725 = vrsqrt.f32 %v2113_v46  ;;  %vm2120_vm5 = vweird.f32 %v2113_v46 }
 0xeb9   : > { %v2726_v47 = vpop.eup %2725 }
 0xeba   : > { %v2115_v48 = vmul.f32 %v2726_v47, %v2113_v46  ;;  %vm2121_vm12 = vweird.f32 %v2726_v47 }
 0xebb   : > { %vm2122_vm14 = vmor %vm2120_vm5, %vm2121_vm12 }
 0xebc   : > { %v2116_v52 = vmul.f32 %v2726_v47, %v2115_v48 }
 0xebe   : > { %v2117_v49 = vmul.f32 0.5, %v2116_v52 }
 0xec0   : > { %v2118_v50 = vsub.f32 1.5, %v2117_v49 }
 0xec2   : > { %v2119_v53 = vmul.f32 %v2726_v47, %v2118_v50 }
 0xec4   : > { %v2123_v56 = vsel %vm2122_vm14, %v2726_v47, %v2119_v53 }
 0xec5   : > { %2599 = vpush %v2123_v56 }
 0xef6   : > { %s2600_s0 = spop %2599 }
 0xef7   : > { %v2129_v62 = vstv %s2600_s0 }
 0xef8   : > { %v2130_v63 = vmul.f32 %v2129_v62, %v2126_v59  ;;  %v2131_v0 = vmul.f32 %v2129_v62, %v2127_v60  ;;  %v2132_v1 = vmul.f32 %v2129_v62, %v2128_v61 }
 0xefa   : > { %v2136_v3 = vmul.f32 %v2712_v55, %v2130_v63  ;;  %v2137_v4 = vmul.f32 %v2712_v55, %v2131_v0  ;;  %v2138_v5 = vmul.f32 %v2712_v55, %v2132_v1 }
 0xefc   : > { %v2142_v6 = vadd.f32 %v2713_v2, %v2136_v3  ;;  %v2143_v8 = vadd.f32 %v2713_v2, %v2137_v4  ;;  %v2144_v9 = vadd.f32 %v2713_v2, %v2138_v5 }
 0xefe   : > { %v2145_v10 = vpack.c.bf16 %v2143_v8, %v2142_v6  ;;  %v2146_v11 = vpack.c.bf16 %v2144_v9, %v2144_v9 }
 0xf00   : > { %v2160_v13 = vrot.slane %v2145_v10, 2  ;;  %v2161_v15 = vrot.slane %v2146_v11, 2 }
 0xf02   : > { %v2162_v14 = vsel %vm1168_vm2, %v2160_v13, %v2161_v15 }
 0xf03   : > { %2537 = vmatmul.msk.bf16.vlgmr.msra.gmra.mxu2 %vm1367_vm13, %v2162_v14 }
 0xf86   : > { %v2187_v16 = vpop.f32.mrf.mxu2 }
 0xf87   : > { %v2188_v17 = vadd.f32 %v2714_v12, %v2187_v16 }
 0xf89   : > { %v2194_v18 = vadd.f32 %v2188_v17, %v3239_v40 }
 0xf8b   : > { %2196 = vst.msk [vmem:[#allocation2] sm:$0xff] %vm992_vm9, %v2194_v18 }
 0xf8e   : > { %v2189_v19 = vpop.f32.mrf.mxu2 }
 0xf8f   : > { %v2190_v20 = vadd.f32 %v2714_v12, %v2189_v19  ;;  %2201 = sbr.rel (%p2538_p1) target bundleno = 4240 (0x1090), region = 100 }
 0xf91   : > { %v2195_v21 = vadd.f32 %v2190_v20, %v3241_v41 }
 0xf93   : > { %2197 = vst.msk [vmem:[#allocation2 + $0x8] sm:$0xff] %vm992_vm9, %v2195_v21 }
 0xf94   : > { %v2728_v22 = vld [vmem:[#allocation4] ss:$0 sm:$0xff]  ;;  %v2831_v23 = vmov 0   ;;  %v2832_v33 = vmov 1.0   ;;  %vm2238_vm15 = vcmask 122880  }
 0xf95   : > { %2727 = vset.pattern.permute.xlu0 %v2831_v23  ;;  %v2202_v25 = vld [vmem:[#allocation2] sm:$0xff] }
 0xf96   : > { %2210 = vperm.xlu0 %2727, %v2728_v22   ;;  %vm2205_vm13 = vcmp.ge.f32.partialorder %v2202_v25, 0.0 }
 0xf9a   : > { %v2203_v24 = vld [vmem:[#allocation2 + $0x8] sm:$0xff] }
 0xf9b   : > { %vm2206_vm2 = vcmp.ge.f32.partialorder %v2203_v24, 0.0 }
0x1008   : > { %v2211_v26 = vpop.permute.xlu0 %2210 }
0x1009   : > { %v2213_v40 = vmul.f32 %v2211_v26, %v2202_v25  ;;  %v2214_v27 = vmul.f32 %v2211_v26, %v2203_v24 }
0x100b   : > { %v2216_v29 = vsel %vm2206_vm2, %v2203_v24, %v2214_v27  ;;  %v2215_v41 = vsel %vm2205_vm13, %v2202_v25, %v2213_v40 }
0x100c   : > { %2231 = vmatpush.msra.mxu0 %v2216_v29 }
0x100e   : > { %2232 = vmatpush.msra.mxu0 %v2215_v41 }
0x100f   : > { %2539 = vmatmul.msk.f32.vlgmr.msra.gmra.mxu0 %vm992_vm9, %v2832_v33 }
0x108c   : > { %v2234_v31 = vpop.f32.mrf.mxu0 }
0x108d   : > { %v2237_v28 = vmul.f32 0.0625, %v2234_v31 }
0x108f   : > { %2239 = vst.msk [vmem:[%s3069_s7] sm:$0x1] %vm2238_vm15, %v2237_v28 }
0x1090 PF: > { %s3420_s19 = sld [smem:[#allocation10_spill]]  ;;  %s2251_s21 = sshll.u32 %s3069_s7, 4  ;;  %s2252_s21 = int_to_ptr.vmem [resolvable:$true] %s2251_s21 }
0x1091   : > { %s3421_s28 = sld [smem:[#allocation31_spill]]  ;;  %s3423_s29 = sand.u32 1, %s2799_s30  }
0x1092   : > { %s2241_s23 = scalar_lea.sflag [#allocation6], %s3423_s29 }
0x1097   : > { %s2249_s18 = scalar_lea.hbm %s3421_s28, %s3420_s19  ;;  %s2749_s5 = scalar_lea.hbm %s3421_s28, 2 }
0x1098   : > { %s2253_s2 = sshll.u32 %s2249_s18, 4  ;;  %s2254_s2 = int_to_ptr.hbm [resolvable:$true] %s2253_s2 }
0x1099   : > { %s2743_s3 = sshra.s32 %s2254_s2, 4  ;;  %s2744_s3 = int_to_ptr.hbm [resolvable:$true] %s2743_s3 }
0x109a   : > { %s2745_s27 = scalar_lea.hbm %s2744_s3, 1  ;;  %p2750_p6 = scmp.lt.s32.totalorder %s2744_s3, %s3421_s28 }
0x109b   : > { %p2746_p2 = scmp.ne.s32.totalorder %s2744_s3, %s2745_s27  ;;  %p2751_p7 = scmp.lt.s32.totalorder %s2749_s5, %s2745_s27 }
0x109d   : > { %p2747_p4 = pnand %p2746_p2, %p2980_p3  ;;  %p2752_p8 = por %p2751_p7, %p2750_p6 }
0x109f   : > { %p2748_p5 = pneg %p2747_p4 }
0x10a1   : > { %p2753_p10 = pnand %p2752_p8, %p2748_p5 }
0x10a3   : > { %2756 = shalt.err (!%p2753_p10)
}
0x10a4   : > { %2601 = dma.vmem_to_hbm [thread:$0]  (%p2980_p3), %s2252_s21, 16, %s2254_s2, %s2241_s23  }
0x10a5 PF: > { %s3424_s7 = sld [smem:[#allocation13_spill]] }
0x10a6   : > { %s3425_s17 = sld [smem:[#allocation8_spill]] }
0x10ab   : > { %p2607_p11 = scmp.ge.s32.totalorder %s3424_s7, 2 }
0x10ac   : > { %s2265_s20 = sand.u32 1, %s3425_s17  }
0x10ad   : > { %p2604_p12 = pnand %p2607_p11, %p2990_p9  ;;  %s2266_s8 = scalar_lea.sflag [#allocation6], %s2265_s20 }
0x10af   : > { %p2605_p13 = pneg %p2604_p12 }
0x10b1   : > { %2790 = dma.done.wait (%p2605_p13), %s2266_s8, 16  }
0x10b2   : > { %2792 = vsyncadd (%p2605_p13), %s2266_s8, 4294967280  ;;  %s33_s22 = sadd.s32 1, %s3424_s7   ;;  %s3427_s10 = sld [smem:[#allocation9_spill]] }
0x10b3   : > { %p30_p0 = scmp.ge.s32.totalorder %s33_s22, 6   ;;  %s3428_s0 = sld [smem:[#allocation18_spill]] }
0x10b4   : > { %s3429_s19 = sld [smem:[#allocation11_spill]]  ;;  %s3433_s29 = smov %s2799_s30 }
0x10b5   : > { %s3430_s1 = sld [smem:[#allocation12_spill]]  ;;  %32 = sbr.rel (!%p30_p0) target bundleno = 19 (0x13), region = 195 }
0x10b6   : > { %s3431_s20 = sld [smem:[#allocation14_spill]] }
0x10b7   : > { %s3432_s21 = sld [smem:[#allocation16_spill]] }
0x10b8   : > { %s3434_s30 = smov %s3427_s10 }
0x10ba   :  { %2271 = vsyncpa [#allocation6], 1 }
0x10bb   :  { %2273 = vsyncpa [#allocation6 + $0x1], 1 }

</bundles_post_ra>
